<compile_context>
chip_gen: v5e
topology: v5e:2x2
jax: 0.10.0
libtpu: 0.0.40
codegen_flags: <defaults>
</compile_context>

<pallas_src>
import functools

import jax
import jax.numpy as jnp
from jax.experimental import pallas as pl
from jax.experimental.pallas import tpu as pltpu


def _pack_factor(board_x, board_y, max_k=256):
    """Largest P dividing board_x with P*board_y <= max_k (MXU contraction depth).
    max_k=256 fills the v6e/v7x 256x256 MXU in one pass; use max_k=128 on v5e."""
    p = 1
    for cand in range(1, board_x + 1):
        if board_x % cand == 0 and cand * board_y <= max_k:
            p = cand
    return p


def _choose_tile_b(batch, board_x, target_rows):
    """Whole batches per tile.  Multiple of 8 (unless batch <= 8, where the single
    block spans the full array), sized for ~target_rows board rows per tile, and
    capped so the grid has >= 2 steps whenever batch > 8 (keeps both v7x TCs busy)."""
    if batch <= 8:
        return batch
    target_b = max(8, (target_rows // board_x // 8) * 8)
    cap = max(8, (((batch + 1) // 2) // 8) * 8)     # ensures >= 2 grid steps
    return min(target_b, cap)


def prepare_params(params, board_x, board_y, *, max_k=256):
    """One-time packing of the PyTorch-style parameters for the kernel:
    block-diagonal bf16 fc1/fc2 weights, lane-tiled f32 biases, and the folded
    fc3.fc4 (including the 1/board_x mean factor) as a lane-tiled f32 vector."""
    p = _pack_factor(board_x, board_y, max_k)
    eye = jnp.eye(p, dtype=jnp.float32)
    w1bd = jnp.kron(eye, params["w1"]).astype(jnp.bfloat16)        # (P*by, P*32)
    w2bd = jnp.kron(eye, params["w2"]).astype(jnp.bfloat16)        # (P*32, P*64)
    b1t = jnp.tile(params["b1"], (1, p)).astype(jnp.float32)       # (1, P*32)
    b2t = jnp.tile(params["b2"], (1, p)).astype(jnp.float32)       # (1, P*64)
    w34 = params["w3"] @ params["w4"]                              # (64, 1)
    b34 = params["b3"] @ params["w4"] + params["b4"]               # (1, 1)
    w34t = (jnp.tile(w34[:, 0], p)[None, :] / float(board_x)).astype(jnp.float32)
    return {"w1bd": w1bd, "b1t": b1t, "w2bd": w2bd, "b2t": b2t,
            "w34t": w34t, "b34": b34.astype(jnp.float32)}


def vnet_kernel(x_ref, w1_ref, b1_ref, w2_ref, b2_ref, w34_ref, b34_ref, out_ref):
    tb = out_ref.shape[0]                    # batches in this tile (static)
    q = x_ref.shape[0] // tb                 # packed rows per batch (static)
    x = x_ref[...].astype(jnp.bfloat16)      # in-kernel bf16 cast (hidden under MXU)
    h1 = jnp.dot(x, w1_ref[...], preferred_element_type=jnp.float32) + b1_ref[...]
    h1 = jnp.maximum(h1, 0.0)                                       # (TMP, P*32) f32
    h2 = jnp.dot(h1.astype(jnp.bfloat16), w2_ref[...],
                 preferred_element_type=jnp.float32) + b2_ref[...]
    h2 = jnp.maximum(h2, 0.0)                                       # (TMP, P*64) f32
    # Folded fc3.fc4 (pre-scaled by 1/board_x) applied lane-wise; the per-batch
    # mean then becomes a lane reduction (plus a tiny cross-row sum when q > 1).
    hv = h2 * w34_ref[...]                                          # (TMP, P*64) f32
    s = jnp.sum(hv, axis=-1, keepdims=True)                         # (TMP, 1) f32
    if q > 1:
        # Only hit when board_x*board_y > max_k; relayout of just TMP scalars.
        s = jnp.sum(s.reshape(tb, q), axis=-1, keepdims=True)
    out_ref[...] = jnp.tanh(s + b34_ref[...])


def _const_spec(arr):
    # Full block, constant index_map -> fetched once, resident in VMEM.
    return pl.BlockSpec(arr.shape, lambda i: (0, 0))


@functools.partial(jax.jit,
                   static_argnames=("board_x", "board_y", "target_rows", "max_k"))
def vnet_forward(x, prep, board_x, board_y, target_rows=4096, max_k=256):
    """x: (..., board_x, board_y) float32 -> (B,) float32."""
    p = _pack_factor(board_x, board_y, max_k)
    q = board_x // p
    k1 = p * board_y

    x3 = x.reshape(-1, board_x, board_y)
    batch = x3.shape[0]
    tile_b = _choose_tile_b(batch, board_x, target_rows)
    b_pad = -(-batch // tile_b) * tile_b
    if b_pad != batch:                       # pad awkward batch sizes, slice output
        x3 = jnp.pad(x3, ((0, b_pad - batch), (0, 0), (0, 0)))
    grid = (b_pad // tile_b,)
    tile_mp = tile_b * q

    xp = x3.reshape(b_pad * q, k1)           # free row-major view; stays f32

    out = pl.pallas_call(
        vnet_kernel,
        out_shape=jax.ShapeDtypeStruct((b_pad, 1), jnp.float32),
        grid=grid,
        in_specs=[
            pl.BlockSpec((tile_mp, k1), lambda i: (i, 0)),          # x: tiled rows
            _const_spec(prep["w1bd"]), _const_spec(prep["b1t"]),
            _const_spec(prep["w2bd"]), _const_spec(prep["b2t"]),
            _const_spec(prep["w34t"]), _const_spec(prep["b34"]),
        ],
        out_specs=pl.BlockSpec((tile_b, 1), lambda i: (i, 0)),
        compiler_params=pltpu.CompilerParams(
            dimension_semantics=("parallel",)),
    )(xp, prep["w1bd"], prep["b1t"], prep["w2bd"], prep["b2t"],
      prep["w34t"], prep["b34"])
    return out[:batch, 0]


def init_params(key, board_y):
    """Deterministic init mimicking nn.Linear default (uniform +-1/sqrt(fan_in))."""
    dims = [(board_y, 32), (32, 64), (64, 16), (16, 1)]
    params = {}
    keys = jax.random.split(key, 2 * len(dims))
    for idx, (fan_in, fan_out) in enumerate(dims):
        bound = 1.0 / (fan_in ** 0.5)
        params[f"w{idx + 1}"] = jax.random.uniform(
            keys[2 * idx], (fan_in, fan_out),
            minval=-bound, maxval=bound, dtype=jnp.float32)
        params[f"b{idx + 1}"] = jax.random.uniform(
            keys[2 * idx + 1], (1, fan_out),
            minval=-bound, maxval=bound, dtype=jnp.float32)
    return params


def vnet_reference(x, params, board_x, board_y):
    """Pure-JAX f32 reference matching the PyTorch forward."""
    s = x.reshape(-1, board_x, board_y)
    s = jax.nn.relu(s @ params["w1"] + params["b1"][0])
    s = jax.nn.relu(s @ params["w2"] + params["b2"][0])
    s = s @ params["w3"] + params["b3"][0]
    v = s @ params["w4"] + params["b4"][0]
    v = v.reshape(-1, board_x)
    return jnp.tanh(v.mean(axis=1))


if __name__ == "__main__":
    board_x, board_y = 16, 16
    key = jax.random.PRNGKey(0)
    k_x, k_p, k_x2 = jax.random.split(key, 3)
    params = init_params(k_p, board_y)
    # Hoisted one-time parameter packing (block-diag weights, folded fc3.fc4).
    prep = prepare_params(params, board_x, board_y)

    # Small case: single tile (blocks span the full arrays), grid=(1,).
    B = 2
    x = jax.random.normal(k_x, (B, board_x, board_y), dtype=jnp.float32)
    out = jax.block_until_ready(vnet_forward(x, prep, board_x=board_x, board_y=board_y))
    ref = vnet_reference(x, params, board_x, board_y)
    assert out.shape == (B,)
    # bf16 MXU operands -> compare against f32 reference at bf16-level tolerance.
    assert jnp.allclose(out, ref, atol=2e-2, rtol=2e-2), (out, ref)

    # Larger case exercising the tiled / pipelined grid: tile_b=32, grid=(2,).
    B2 = 64
    x2 = jax.random.normal(k_x2, (B2, board_x, board_y), dtype=jnp.float32)
    out2 = jax.block_until_ready(vnet_forward(x2, prep, board_x=board_x, board_y=board_y))
    ref2 = vnet_reference(x2, params, board_x, board_y)
    assert out2.shape == (B2,)
    assert jnp.allclose(out2, ref2, atol=2e-2, rtol=2e-2), (out2, ref2)

    print("KERNEL_OK")
</pallas_src>

<mosaic_0001>
module attributes {stable_mosaic.version = 11 : i64} {
  func.func @vnet_kernel(%arg0: i32, %arg1: memref<2x256xf32, #tpu.memory_space<vmem>>, %arg2: memref<256x512xbf16, #tpu.memory_space<vmem>>, %arg3: memref<1x512xf32, #tpu.memory_space<vmem>>, %arg4: memref<512x1024xbf16, #tpu.memory_space<vmem>>, %arg5: memref<1x1024xf32, #tpu.memory_space<vmem>>, %arg6: memref<1x1024xf32, #tpu.memory_space<vmem>>, %arg7: memref<1x1xf32, #tpu.memory_space<vmem>>, %arg8: memref<2x1xf32, #tpu.memory_space<vmem>>) attributes {dimension_semantics = [#tpu.dimension_semantics<parallel>], iteration_bounds = array<i64: 1>, scalar_prefetch = 0 : i64, scratch_operands = 0 : i64, tpu.core_type = #tpu.core_type<tc>, window_params = [{transform_indices = @transform_0, window_bounds = array<i64: 2, 256>}, {pipeline_mode = #tpu.pipeline_mode<synchronous>, transform_indices = @transform_1, window_bounds = array<i64: 256, 512>}, {pipeline_mode = #tpu.pipeline_mode<synchronous>, transform_indices = @transform_2, window_bounds = array<i64: 1, 512>}, {pipeline_mode = #tpu.pipeline_mode<synchronous>, transform_indices = @transform_3, window_bounds = array<i64: 512, 1024>}, {pipeline_mode = #tpu.pipeline_mode<synchronous>, transform_indices = @transform_4, window_bounds = array<i64: 1, 1024>}, {pipeline_mode = #tpu.pipeline_mode<synchronous>, transform_indices = @transform_5, window_bounds = array<i64: 1, 1024>}, {pipeline_mode = #tpu.pipeline_mode<synchronous>, transform_indices = @transform_6, window_bounds = array<i64: 1, 1>}, {transform_indices = @transform_7, window_bounds = array<i64: 2, 1>}]} {
    %c0 = arith.constant 0 : index
    %c0_0 = arith.constant 0 : index
    %0 = vector.load %arg1[%c0, %c0_0] : memref<2x256xf32, #tpu.memory_space<vmem>>, vector<2x256xf32>
    %1 = arith.truncf %0 : vector<2x256xf32> to vector<2x256xbf16>
    %c0_1 = arith.constant 0 : index
    %c0_2 = arith.constant 0 : index
    %2 = vector.load %arg2[%c0_1, %c0_2] : memref<256x512xbf16, #tpu.memory_space<vmem>>, vector<256x512xbf16>
    %cst = arith.constant dense<0.000000e+00> : vector<2x512xf32>
    %3 = tpu.matmul %1, %2, %cst {dimension_numbers = #tpu.dot_dimension_numbers<[1], [0], [0], [1], [0, 0, 1, 1], [], []>} : vector<2x256xbf16>, vector<256x512xbf16>, vector<2x512xf32> -> vector<2x512xf32>
    %c0_3 = arith.constant 0 : index
    %c0_4 = arith.constant 0 : index
    %4 = vector.load %arg3[%c0_3, %c0_4] : memref<1x512xf32, #tpu.memory_space<vmem>>, vector<1x512xf32>
    %5 = vector.broadcast %4 : vector<1x512xf32> to vector<2x512xf32>
    %6 = arith.addf %3, %5 : vector<2x512xf32>
    %cst_5 = arith.constant 0.000000e+00 : f32
    %7 = vector.broadcast %cst_5 : f32 to vector<2x512xf32>
    %8 = arith.maximumf %6, %7 : vector<2x512xf32>
    %9 = arith.truncf %8 : vector<2x512xf32> to vector<2x512xbf16>
    %c0_6 = arith.constant 0 : index
    %c0_7 = arith.constant 0 : index
    %10 = vector.load %arg4[%c0_6, %c0_7] : memref<512x1024xbf16, #tpu.memory_space<vmem>>, vector<512x1024xbf16>
    %cst_8 = arith.constant dense<0.000000e+00> : vector<2x1024xf32>
    %11 = tpu.matmul %9, %10, %cst_8 {dimension_numbers = #tpu.dot_dimension_numbers<[1], [0], [0], [1], [0, 0, 1, 1], [], []>} : vector<2x512xbf16>, vector<512x1024xbf16>, vector<2x1024xf32> -> vector<2x1024xf32>
    %c0_9 = arith.constant 0 : index
    %c0_10 = arith.constant 0 : index
    %12 = vector.load %arg5[%c0_9, %c0_10] : memref<1x1024xf32, #tpu.memory_space<vmem>>, vector<1x1024xf32>
    %13 = vector.broadcast %12 : vector<1x1024xf32> to vector<2x1024xf32>
    %14 = arith.addf %11, %13 : vector<2x1024xf32>
    %cst_11 = arith.constant 0.000000e+00 : f32
    %15 = vector.broadcast %cst_11 : f32 to vector<2x1024xf32>
    %16 = arith.maximumf %14, %15 : vector<2x1024xf32>
    %c0_12 = arith.constant 0 : index
    %c0_13 = arith.constant 0 : index
    %17 = vector.load %arg6[%c0_12, %c0_13] : memref<1x1024xf32, #tpu.memory_space<vmem>>, vector<1x1024xf32>
    %18 = vector.broadcast %17 : vector<1x1024xf32> to vector<2x1024xf32>
    %19 = arith.mulf %16, %18 : vector<2x1024xf32>
    %cst_14 = arith.constant dense<0.000000e+00> : vector<2xf32>
    %20 = vector.multi_reduction <add>, %19, %cst_14 [1] : vector<2x1024xf32> to vector<2xf32>
    %21 = vector.shape_cast %20 : vector<2xf32> to vector<2x1xf32>
    %c0_15 = arith.constant 0 : index
    %c0_16 = arith.constant 0 : index
    %22 = vector.load %arg7[%c0_15, %c0_16] : memref<1x1xf32, #tpu.memory_space<vmem>>, vector<1x1xf32>
    %23 = vector.broadcast %22 : vector<1x1xf32> to vector<2x1xf32>
    %24 = arith.addf %21, %23 : vector<2x1xf32>
    %25 = math.tanh %24 : vector<2x1xf32>
    %c0_17 = arith.constant 0 : index
    %c0_18 = arith.constant 0 : index
    %26 = vector.load %arg8[%c0_17, %c0_18] : memref<2x1xf32, #tpu.memory_space<vmem>>, vector<2x1xf32>
    tpu.vector_store %arg8[%c0_17, %c0_18], %25 {strides = array<i32>} : memref<2x1xf32, #tpu.memory_space<vmem>>, vector<2x1xf32>,
    return
  }
  func.func @transform_0(%arg0: i32) -> (i32, i32) {
    %c0_i32 = arith.constant 0 : i32
    %c0_i32_0 = arith.constant 0 : i32
    return %arg0, %c0_i32 : i32, i32
  }
  func.func @transform_1(%arg0: i32) -> (i32, i32) {
    %c0_i32 = arith.constant 0 : i32
    %c0_i32_0 = arith.constant 0 : i32
    %c0_i32_1 = arith.constant 0 : i32
    return %c0_i32, %c0_i32_0 : i32, i32
  }
  func.func @transform_2(%arg0: i32) -> (i32, i32) {
    %c0_i32 = arith.constant 0 : i32
    %c0_i32_0 = arith.constant 0 : i32
    %c0_i32_1 = arith.constant 0 : i32
    return %c0_i32, %c0_i32_0 : i32, i32
  }
  func.func @transform_3(%arg0: i32) -> (i32, i32) {
    %c0_i32 = arith.constant 0 : i32
    %c0_i32_0 = arith.constant 0 : i32
    %c0_i32_1 = arith.constant 0 : i32
    return %c0_i32, %c0_i32_0 : i32, i32
  }
  func.func @transform_4(%arg0: i32) -> (i32, i32) {
    %c0_i32 = arith.constant 0 : i32
    %c0_i32_0 = arith.constant 0 : i32
    %c0_i32_1 = arith.constant 0 : i32
    return %c0_i32, %c0_i32_0 : i32, i32
  }
  func.func @transform_5(%arg0: i32) -> (i32, i32) {
    %c0_i32 = arith.constant 0 : i32
    %c0_i32_0 = arith.constant 0 : i32
    %c0_i32_1 = arith.constant 0 : i32
    return %c0_i32, %c0_i32_0 : i32, i32
  }
  func.func @transform_6(%arg0: i32) -> (i32, i32) {
    %c0_i32 = arith.constant 0 : i32
    %c0_i32_0 = arith.constant 0 : i32
    %c0_i32_1 = arith.constant 0 : i32
    return %c0_i32, %c0_i32_0 : i32, i32
  }
  func.func @transform_7(%arg0: i32) -> (i32, i32) {
    %c0_i32 = arith.constant 0 : i32
    %c0_i32_0 = arith.constant 0 : i32
    return %arg0, %c0_i32 : i32, i32
  }
}

</mosaic_0001>

<bundles_post_ra>
// kernel: vnet_forward.1
= control target key start
LH: loop header
LB: loop body
LE: loop exit
PB: predicated region body
PF: predicated region fallthrough
CT: control target
= control target key end

     0   :  { %s4440_s0 = inlined_call_operand.vmem [shape: f32[2,256], index: 0, kind: input, shape index: {}]   ;;  %s4441_s1 = inlined_call_operand.hbm [shape: bf16[256,512], index: 1, kind: input, shape index: {}]   ;;  %s4442_s2 = inlined_call_operand.vmem [shape: f32[1,512], index: 2, kind: input, shape index: {}]   ;;  %s4443_s3 = inlined_call_operand.hbm [shape: bf16[512,1024], index: 3, kind: input, shape index: {}]   ;;  %s4444_s4 = inlined_call_operand.vmem [shape: f32[1,1024], index: 4, kind: input, shape index: {}]   ;;  %s4445_s5 = inlined_call_operand.vmem [shape: f32[1,1024], index: 5, kind: input, shape index: {}]   ;;  %s4446_s6 = inlined_call_operand.<no memory space> [shape: f32[1,1], index: 6, kind: input, shape index: {}]   ;;  %s4447_s7 = inlined_call_operand.vmem [shape: f32[2,1], index: 7, kind: output, shape index: {}]  }
   0x1   :  { %v12_v0 = vstv %s4446_s6 }
   0x2   :  { %13 = vst [vmem:[#allocation2] sm:$0x1] %v12_v0 }
   0x3   :  { %14 = vsyncpa [#allocation4], 0  ;;  %s22_s28 = sshll.u32 %s4441_s1, 4  ;;  %s23_s28 = int_to_ptr.hbm [resolvable:$true] %s22_s28 }
   0x4   :  { %15 = vsyncpa [#allocation6], 0  ;;  %s4272_s29 = smov [#allocation3]   ;;  %s37_s10 = sshll.u32 %s4443_s3, 4  ;;  %s38_s10 = int_to_ptr.hbm [resolvable:$true] %s37_s10 }
   0x5   :  { %s24_s30 = sshll.u32 %s4272_s29, 4  ;;  %s4273_s11 = smov 256   ;;  %s25_s30 = int_to_ptr.vmem [resolvable:$true] %s24_s30 }
   0x6   :  { %s4274_s12 = smov 16   ;;  %s4275_s6 = smov [#allocation5]  }
   0x7   :  { %30 = dma.hbm_to_vmem [thread:$0]  %s23_s28, 8192, %s25_s30, [#allocation4], %s4273_s11, %s4273_s11, %s4274_s12  }
   0x8   :  { %s39_s13 = sshll.u32 %s4275_s6, 4  ;;  %s4276_s14 = smov 512   ;;  %s40_s13 = int_to_ptr.vmem [resolvable:$true] %s39_s13 }
   0x9   :  { %s4277_s15 = smov 32  }
   0xa   :  { %45 = dma.hbm_to_vmem [thread:$0]  %s38_s10, 32768, %s40_s13, [#allocation6], %s4276_s14, %s4276_s14, %s4277_s15  }
   0xb   :  { %4268 = dma.done.wait [#allocation4], 8192  }
   0xc   :  { %4269 = vsyncadd [#allocation4], 4294959104 }
   0xd   :  { %4270 = dma.done.wait [#allocation6], 32768  }
   0xe   :  { %4271 = vsyncadd [#allocation6], 4294934528  ;;  %v2725_v1 = vld [vmem:[#allocation3 + $0xe0] sm:$0xf]  ;;  %v3921_v2 = vld [vmem:[#allocation3 + $0xec] sm:$0xf0] }
   0xf   :  { %v2853_v3 = vld [vmem:[#allocation3 + $0x1e0] sm:$0xf]  ;;  %v2726_v4 = vor.u32 %v3921_v2, %v2725_v1  ;;  %v3953_v5 = vld [vmem:[#allocation3 + $0x1ec] sm:$0xf0]  ;;  %v3919_v6 = vld [vmem:[#allocation3 + $0xe4] sm:$0xf] }
  0x10   :  { %v2727_v7 = vld [vmem:[#allocation3 + $0xf0] sm:$0xf0]  ;;  %v2854_v8 = vor.u32 %v3953_v5, %v2853_v3  ;;  %v3951_v10 = vld [vmem:[#allocation3 + $0x1e4] sm:$0xf]  ;;  %v2709_v12 = vld [vmem:[#allocation3 + $0xc0] sm:$0xf] }
  0x11   :  { %v2730_v9 = vor.u32 %v3919_v6, %v2727_v7  ;;  %v2855_v11 = vld [vmem:[#allocation3 + $0x1f0] sm:$0xf0]  ;;  %463 = vmatpush.bf16.msra.mxu0 %v2726_v4  ;;  %v3917_v14 = vld [vmem:[#allocation3 + $0xcc] sm:$0xf0]  ;;  %v2837_v15 = vld [vmem:[#allocation3 + $0x1c0] sm:$0xf] }
  0x12   :  { %v2858_v13 = vor.u32 %v3951_v10, %v2855_v11  ;;  %v3949_v16 = vld [vmem:[#allocation3 + $0x1cc] sm:$0xf0]  ;;  %476 = vmatpush.bf16.msra.mxu1 %v2854_v8  ;;  %v2710_v17 = vor.u32 %v3917_v14, %v2709_v12  ;;  %v3915_v19 = vld [vmem:[#allocation3 + $0xc4] sm:$0xf]  ;;  %v2711_v20 = vld [vmem:[#allocation3 + $0xd0] sm:$0xf0] }
  0x13   :  { %489 = vmatpush.bf16.msra.mxu2 %v2730_v9  ;;  %v2838_v18 = vor.u32 %v3949_v16, %v2837_v15  ;;  %v3947_v21 = vld [vmem:[#allocation3 + $0x1c4] sm:$0xf]  ;;  %v2714_v22 = vor.u32 %v3915_v19, %v2711_v20  ;;  %v2839_v23 = vld [vmem:[#allocation3 + $0x1d0] sm:$0xf0]  ;;  %v2693_v24 = vld [vmem:[#allocation3 + $0xa0] sm:$0xf] }
  0x14   :  { %502 = vmatpush.bf16.msra.mxu3 %v2858_v13  ;;  %v3913_v25 = vld [vmem:[#allocation3 + $0xac] sm:$0xf0]  ;;  %v2842_v26 = vor.u32 %v3947_v21, %v2839_v23  ;;  %v2821_v27 = vld [vmem:[#allocation3 + $0x1a0] sm:$0xf]  ;;  %v3911_v29 = vld [vmem:[#allocation3 + $0xa4] sm:$0xf] }
  0x15   :  { %v3945_v28 = vld [vmem:[#allocation3 + $0x1ac] sm:$0xf0]  ;;  %464 = vmatpush.bf16.msra.mxu0 %v2710_v17  ;;  %v2694_v30 = vor.u32 %v3913_v25, %v2693_v24  ;;  %v2695_v31 = vld [vmem:[#allocation3 + $0xb0] sm:$0xf0]  ;;  %v3943_v32 = vld [vmem:[#allocation3 + $0x1a4] sm:$0xf] }
  0x16   :  { %v2823_v33 = vld [vmem:[#allocation3 + $0x1b0] sm:$0xf0]  ;;  %477 = vmatpush.bf16.msra.mxu1 %v2838_v18  ;;  %v2822_v34 = vor.u32 %v3945_v28, %v2821_v27  ;;  %v2698_v35 = vor.u32 %v3911_v29, %v2695_v31  ;;  %v2677_v36 = vld [vmem:[#allocation3 + $0x80] sm:$0xf]  ;;  %v3909_v37 = vld [vmem:[#allocation3 + $0x8c] sm:$0xf0] }
  0x17   :  { %490 = vmatpush.bf16.msra.mxu2 %v2714_v22  ;;  %v2805_v38 = vld [vmem:[#allocation3 + $0x180] sm:$0xf]  ;;  %v2826_v39 = vor.u32 %v3943_v32, %v2823_v33  ;;  %v3941_v40 = vld [vmem:[#allocation3 + $0x18c] sm:$0xf0]  ;;  %v3907_v41 = vld [vmem:[#allocation3 + $0x84] sm:$0xf]  ;;  %v2678_v45 = vor.u32 %v3909_v37, %v2677_v36 }
  0x18   :  { %503 = vmatpush.bf16.msra.mxu3 %v2842_v26  ;;  %v2679_v42 = vld [vmem:[#allocation3 + $0x90] sm:$0xf0]  ;;  %v3939_v43 = vld [vmem:[#allocation3 + $0x184] sm:$0xf]  ;;  %v2806_v46 = vor.u32 %v3941_v40, %v2805_v38  ;;  %v2661_v48 = vld [vmem:[#allocation3 + $0x60] sm:$0xf] }
  0x19   :  { %v2807_v44 = vld [vmem:[#allocation3 + $0x190] sm:$0xf0]  ;;  %465 = vmatpush.bf16.msra.mxu0 %v2694_v30  ;;  %v2682_v47 = vor.u32 %v3907_v41, %v2679_v42  ;;  %v3905_v49 = vld [vmem:[#allocation3 + $0x6c] sm:$0xf0]  ;;  %v2789_v50 = vld [vmem:[#allocation3 + $0x160] sm:$0xf] }
  0x1a   :  { %478 = vmatpush.bf16.msra.mxu1 %v2822_v34  ;;  %v2810_v51 = vor.u32 %v3939_v43, %v2807_v44  ;;  %v3937_v52 = vld [vmem:[#allocation3 + $0x16c] sm:$0xf0]  ;;  %v3903_v53 = vld [vmem:[#allocation3 + $0x64] sm:$0xf]  ;;  %v2663_v54 = vld [vmem:[#allocation3 + $0x70] sm:$0xf0]  ;;  %v2662_v57 = vor.u32 %v3905_v49, %v2661_v48 }
  0x1b   :  { %491 = vmatpush.bf16.msra.mxu2 %v2698_v35  ;;  %v3935_v55 = vld [vmem:[#allocation3 + $0x164] sm:$0xf]  ;;  %v2791_v56 = vld [vmem:[#allocation3 + $0x170] sm:$0xf0]  ;;  %v2790_v58 = vor.u32 %v3937_v52, %v2789_v50  ;;  %v2666_v59 = vor.u32 %v3903_v53, %v2663_v54  ;;  %v2645_v60 = vld [vmem:[#allocation3 + $0x40] sm:$0xf] }
  0x1c   :  { %504 = vmatpush.bf16.msra.mxu3 %v2826_v39  ;;  %v3901_v61 = vld [vmem:[#allocation3 + $0x4c] sm:$0xf0]  ;;  %v2773_v62 = vld [vmem:[#allocation3 + $0x140] sm:$0xf]  ;;  %v2794_v63 = vor.u32 %v3935_v55, %v2791_v56  ;;  %v3899_v1 = vld [vmem:[#allocation3 + $0x44] sm:$0xf] }
  0x1d   :  { %466 = vmatpush.bf16.msra.mxu0 %v2678_v45  ;;  %v3933_v0 = vld [vmem:[#allocation3 + $0x14c] sm:$0xf0]  ;;  %v2647_v2 = vld [vmem:[#allocation3 + $0x50] sm:$0xf0]  ;;  %v3931_v3 = vld [vmem:[#allocation3 + $0x144] sm:$0xf]  ;;  %v2646_v5 = vor.u32 %v3901_v61, %v2645_v60 }
  0x1e   :  { %479 = vmatpush.bf16.msra.mxu1 %v2806_v46  ;;  %v2775_v4 = vld [vmem:[#allocation3 + $0x150] sm:$0xf0]  ;;  %v2774_v6 = vor.u32 %v3933_v0, %v2773_v62  ;;  %v2650_v7 = vor.u32 %v3899_v1, %v2647_v2  ;;  %v2629_v8 = vld [vmem:[#allocation3 + $0x20] sm:$0xf]  ;;  %v3897_v9 = vld [vmem:[#allocation3 + $0x2c] sm:$0xf0] }
  0x1f   :  { %492 = vmatpush.bf16.msra.mxu2 %v2682_v47  ;;  %v2757_v10 = vld [vmem:[#allocation3 + $0x120] sm:$0xf]  ;;  %v2778_v11 = vor.u32 %v3931_v3, %v2775_v4  ;;  %v3929_v12 = vld [vmem:[#allocation3 + $0x12c] sm:$0xf0]  ;;  %v3895_v13 = vld [vmem:[#allocation3 + $0x24] sm:$0xf]  ;;  %v2630_v18 = vor.u32 %v3897_v9, %v2629_v8 }
  0x20   :  { %505 = vmatpush.bf16.msra.mxu3 %v2810_v51  ;;  %v2631_v14 = vld [vmem:[#allocation3 + $0x30] sm:$0xf0]  ;;  %v3927_v15 = vld [vmem:[#allocation3 + $0x124] sm:$0xf]  ;;  %v2613_v17 = vld [vmem:[#allocation3] sm:$0xf]  ;;  %v2758_v22 = vor.u32 %v3929_v12, %v2757_v10 }
  0x21   :  { %467 = vmatpush.bf16.msra.mxu0 %v2662_v57  ;;  %v2759_v16 = vld [vmem:[#allocation3 + $0x130] sm:$0xf0]  ;;  %v3893_v19 = vld [vmem:[#allocation3 + $0xc] sm:$0xf0]  ;;  %v2741_v20 = vld [vmem:[#allocation3 + $0x100] sm:$0xf]  ;;  %v2634_v23 = vor.u32 %v3895_v13, %v2631_v14 }
  0x22   :  { %480 = vmatpush.bf16.msra.mxu1 %v2790_v58  ;;  %v3925_v21 = vld [vmem:[#allocation3 + $0x10c] sm:$0xf0]  ;;  %v3891_v24 = vld [vmem:[#allocation3 + $0x4] sm:$0xf]  ;;  %v2615_v25 = vld [vmem:[#allocation3 + $0x10] sm:$0xf0]  ;;  %v2762_v27 = vor.u32 %v3927_v15, %v2759_v16  ;;  %v2614_v33 = vor.u32 %v3893_v19, %v2613_v17 }
  0x23   :  { %493 = vmatpush.bf16.msra.mxu2 %v2666_v59  ;;  %v60_v26 = vld [vmem:[%s4440_s0] sm:$0xf]  ;;  %v3923_v28 = vld [vmem:[#allocation3 + $0x104] sm:$0xf]  ;;  %v2733_v30 = vld [vmem:[#allocation3 + $0xe8] sm:$0xf]  ;;  %v2742_v37 = vor.u32 %v3925_v21, %v2741_v20  ;;  %v2618_v38 = vor.u32 %v3891_v24, %v2615_v25 }
  0x24   :  { %506 = vmatpush.bf16.msra.mxu3 %v2794_v63  ;;  %v2743_v29 = vld [vmem:[#allocation3 + $0x110] sm:$0xf0]  ;;  %62 = vst [vmem:[#allocation1] ss:$4 sm:$0xff] %v60_v26  ;;  %v3922_v31 = vld [vmem:[#allocation3 + $0xf4] sm:$0xf0] }
  0x25   :  { %468 = vmatpush.bf16.msra.mxu0 %v2646_v5  ;;  %v2861_v32 = vld [vmem:[#allocation3 + $0x1e8] sm:$0xf]  ;;  %v3954_v34 = vld [vmem:[#allocation3 + $0x1f4] sm:$0xf0]  ;;  %v3920_v35 = vld [vmem:[#allocation3 + $0xec] sm:$0xf]  ;;  %v2746_v41 = vor.u32 %v3923_v28, %v2743_v29  ;;  %v2734_v42 = vor.u32 %v3922_v31, %v2733_v30 }
  0x26   :  { %481 = vmatpush.bf16.msra.mxu1 %v2774_v6  ;;  %v2735_v36 = vld [vmem:[#allocation3 + $0xf8] sm:$0xf0]  ;;  %v3952_v39 = vld [vmem:[#allocation3 + $0x1ec] sm:$0xf]  ;;  %v2717_v43 = vld [vmem:[#allocation3 + $0xc8] sm:$0xf]  ;;  %v2862_v45 = vor.u32 %v3954_v34, %v2861_v32 }
  0x27   :  { %494 = vmatpush.bf16.msra.mxu2 %v2650_v7  ;;  %v2863_v40 = vld [vmem:[#allocation3 + $0x1f8] sm:$0xf0]  ;;  %v3918_v44 = vld [vmem:[#allocation3 + $0xd4] sm:$0xf0]  ;;  %v2738_v46 = vor.u32 %v3920_v35, %v2735_v36  ;;  %v2845_v47 = vld [vmem:[#allocation3 + $0x1c8] sm:$0xf] }
  0x28   :  { %507 = vmatpush.bf16.msra.mxu3 %v2778_v11  ;;  %v3950_v48 = vld [vmem:[#allocation3 + $0x1d4] sm:$0xf0]  ;;  %v3916_v49 = vld [vmem:[#allocation3 + $0xcc] sm:$0xf]  ;;  %v2866_v50 = vor.u32 %v3952_v39, %v2863_v40  ;;  %v2719_v51 = vld [vmem:[#allocation3 + $0xd8] sm:$0xf0]  ;;  %v2718_v58 = vor.u32 %v3918_v44, %v2717_v43 }
  0x29   :  { %469 = vmatpush.bf16.msra.mxu0 %v2630_v18  ;;  %v3948_v52 = vld [vmem:[#allocation3 + $0x1cc] sm:$0xf]  ;;  %v2847_v53 = vld [vmem:[#allocation3 + $0x1d8] sm:$0xf0]  ;;  %v2846_v59 = vor.u32 %v3950_v48, %v2845_v47  ;;  %v2722_v60 = vor.u32 %v3916_v49, %v2719_v51  ;;  %v2701_v61 = vld [vmem:[#allocation3 + $0xa8] sm:$0xf] }
  0x2a   :  { %482 = vmatpush.bf16.msra.mxu1 %v2758_v22  ;;  %v3914_v62 = vld [vmem:[#allocation3 + $0xb4] sm:$0xf0]  ;;  %v2829_v63 = vld [vmem:[#allocation3 + $0x1a8] sm:$0xf]  ;;  %v2850_v0 = vor.u32 %v3948_v52, %v2847_v53  ;;  %v3912_v2 = vld [vmem:[#allocation3 + $0xac] sm:$0xf] }
  0x2b   :  { %495 = vmatpush.bf16.msra.mxu2 %v2634_v23  ;;  %v63_v54 = vld.sshfl [vmem:[#allocation1] sm:$0xff pattern:$0x73625140]  ;;  %v64_v55 = vld.sshfl [vmem:[#allocation1 + $0x8] sm:$0xff pattern:$0x73625140]  ;;  %v2702_v6 = vor.u32 %v3914_v62, %v2701_v61 }
  0x2c   :  { %508 = vmatpush.bf16.msra.mxu3 %v2762_v27  ;;  %v4330_v56 = vpack.c.bf16 %v63_v54, %v63_v54  ;;  %v4332_v57 = vpack.c.bf16 %v64_v55, %v64_v55  ;;  %v3946_v1 = vld [vmem:[#allocation3 + $0x1b4] sm:$0xf0]  ;;  %v2703_v3 = vld [vmem:[#allocation3 + $0xb8] sm:$0xf0]  ;;  %v3944_v4 = vld [vmem:[#allocation3 + $0x1ac] sm:$0xf] }
  0x2d   :  { %470 = vmatpush.bf16.msra.mxu0 %v2614_v33  ;;  %v2831_v5 = vld [vmem:[#allocation3 + $0x1b8] sm:$0xf0]  ;;  %v2830_v7 = vor.u32 %v3946_v1, %v2829_v63  ;;  %v2706_v8 = vor.u32 %v3912_v2, %v2703_v3  ;;  %v2685_v9 = vld [vmem:[#allocation3 + $0x88] sm:$0xf]  ;;  %v3910_v10 = vld [vmem:[#allocation3 + $0x94] sm:$0xf0] }
  0x2e   :  { %483 = vmatpush.bf16.msra.mxu1 %v2742_v37  ;;  %v2813_v11 = vld [vmem:[#allocation3 + $0x188] sm:$0xf]  ;;  %v2834_v12 = vor.u32 %v3944_v4, %v2831_v5  ;;  %v3942_v13 = vld [vmem:[#allocation3 + $0x194] sm:$0xf0]  ;;  %v3908_v14 = vld [vmem:[#allocation3 + $0x8c] sm:$0xf]  ;;  %v2686_v18 = vor.u32 %v3910_v10, %v2685_v9 }
  0x2f   :  { %496 = vmatpush.bf16.msra.mxu2 %v2618_v38  ;;  %v2687_v15 = vld [vmem:[#allocation3 + $0x98] sm:$0xf0]  ;;  %v3940_v16 = vld [vmem:[#allocation3 + $0x18c] sm:$0xf]  ;;  %v2814_v19 = vor.u32 %v3942_v13, %v2813_v11  ;;  %v2669_v21 = vld [vmem:[#allocation3 + $0x68] sm:$0xf] }
  0x30   :  { %509 = vmatpush.bf16.msra.mxu3 %v2746_v41  ;;  %471 = vmatmul.bf16.vlgmr.msra.gmra.mxu0 %v4330_v56  ;;  %v2815_v17 = vld [vmem:[#allocation3 + $0x198] sm:$0xf0]  ;;  %v2690_v20 = vor.u32 %v3908_v14, %v2687_v15  ;;  %v3906_v22 = vld [vmem:[#allocation3 + $0x74] sm:$0xf0]  ;;  %v2797_v23 = vld [vmem:[#allocation3 + $0x168] sm:$0xf] }
  0x31   :  { %515 = vmatpush.bf16.msrb.mxu0 %v2734_v42  ;;  %484 = vmatmul.bf16.vlgmr.msra.gmra.mxu1 %v4332_v57  ;;  %v2818_v24 = vor.u32 %v3940_v16, %v2815_v17  ;;  %v3938_v25 = vld [vmem:[#allocation3 + $0x174] sm:$0xf0]  ;;  %v3904_v26 = vld [vmem:[#allocation3 + $0x6c] sm:$0xf]  ;;  %v2671_v27 = vld [vmem:[#allocation3 + $0x78] sm:$0xf0]  ;;  %v2670_v30 = vor.u32 %v3906_v22, %v2669_v21 }
  0x32   :  { %528 = vmatpush.bf16.msrb.mxu1 %v2862_v45  ;;  %497 = vmatmul.bf16.vlgmr.msra.gmra.mxu2 %v4330_v56  ;;  %v3936_v28 = vld [vmem:[#allocation3 + $0x16c] sm:$0xf]  ;;  %v2799_v29 = vld [vmem:[#allocation3 + $0x178] sm:$0xf0]  ;;  %v2798_v31 = vor.u32 %v3938_v25, %v2797_v23  ;;  %v2674_v32 = vor.u32 %v3904_v26, %v2671_v27  ;;  %v2653_v33 = vld [vmem:[#allocation3 + $0x48] sm:$0xf] }
  0x33   :  { %541 = vmatpush.bf16.msrb.mxu2 %v2738_v46  ;;  %510 = vmatmul.bf16.vlgmr.msra.gmra.mxu3 %v4332_v57  ;;  %v3902_v34 = vld [vmem:[#allocation3 + $0x54] sm:$0xf0]  ;;  %v2781_v35 = vld [vmem:[#allocation3 + $0x148] sm:$0xf]  ;;  %v2802_v36 = vor.u32 %v3936_v28, %v2799_v29  ;;  %v3900_v38 = vld [vmem:[#allocation3 + $0x4c] sm:$0xf] }
  0x34   :  { %554 = vmatpush.bf16.msrb.mxu3 %v2866_v50  ;;  %v3934_v37 = vld [vmem:[#allocation3 + $0x154] sm:$0xf0]  ;;  %v2655_v39 = vld [vmem:[#allocation3 + $0x58] sm:$0xf0]  ;;  %v3932_v40 = vld [vmem:[#allocation3 + $0x14c] sm:$0xf]  ;;  %v2654_v42 = vor.u32 %v3902_v34, %v2653_v33 }
  0x35   :  { %516 = vmatpush.bf16.msrb.mxu0 %v2718_v58  ;;  %v2783_v41 = vld [vmem:[#allocation3 + $0x158] sm:$0xf0]  ;;  %v2782_v43 = vor.u32 %v3934_v37, %v2781_v35  ;;  %v2658_v44 = vor.u32 %v3900_v38, %v2655_v39  ;;  %v2637_v45 = vld [vmem:[#allocation3 + $0x28] sm:$0xf]  ;;  %v3898_v46 = vld [vmem:[#allocation3 + $0x34] sm:$0xf0] }
  0x36   :  { %529 = vmatpush.bf16.msrb.mxu1 %v2846_v59  ;;  %v2765_v47 = vld [vmem:[#allocation3 + $0x128] sm:$0xf]  ;;  %v2786_v48 = vor.u32 %v3932_v40, %v2783_v41  ;;  %v3930_v49 = vld [vmem:[#allocation3 + $0x134] sm:$0xf0]  ;;  %v3896_v50 = vld [vmem:[#allocation3 + $0x2c] sm:$0xf]  ;;  %v2638_v54 = vor.u32 %v3898_v46, %v2637_v45 }
  0x37   :  { %542 = vmatpush.bf16.msrb.mxu2 %v2722_v60  ;;  %v2639_v51 = vld [vmem:[#allocation3 + $0x38] sm:$0xf0]  ;;  %v3928_v52 = vld [vmem:[#allocation3 + $0x12c] sm:$0xf]  ;;  %v2621_v55 = vld [vmem:[#allocation3 + $0x8] sm:$0xf]  ;;  %v2766_v58 = vor.u32 %v3930_v49, %v2765_v47 }
  0x38   :  { %555 = vmatpush.bf16.msrb.mxu3 %v2850_v0  ;;  %v2767_v53 = vld [vmem:[#allocation3 + $0x138] sm:$0xf0]  ;;  %v2642_v59 = vor.u32 %v3896_v50, %v2639_v51  ;;  %v3894_v60 = vld [vmem:[#allocation3 + $0x14] sm:$0xf0]  ;;  %v2749_v61 = vld [vmem:[#allocation3 + $0x108] sm:$0xf] }
  0x39   :  { %517 = vmatpush.bf16.msrb.mxu0 %v2702_v6  ;;  %v3926_v62 = vld [vmem:[#allocation3 + $0x114] sm:$0xf0]  ;;  %v2770_v63 = vor.u32 %v3928_v52, %v2767_v53  ;;  %v3892_v0 = vld [vmem:[#allocation3 + $0xc] sm:$0xf]  ;;  %v2623_v1 = vld [vmem:[#allocation3 + $0x18] sm:$0xf0]  ;;  %v2622_v6 = vor.u32 %v3894_v60, %v2621_v55 }
  0x3a   :  { %530 = vmatpush.bf16.msrb.mxu1 %v2830_v7  ;;  %v3924_v2 = vld [vmem:[#allocation3 + $0x10c] sm:$0xf]  ;;  %v2751_v3 = vld [vmem:[#allocation3 + $0x118] sm:$0xf0]  ;;  %v3093_v4 = vld [vmem:[#allocation5 + $0x1c0] sm:$0xf]  ;;  %v2750_v9 = vor.u32 %v3926_v62, %v2749_v61  ;;  %v2626_v10 = vor.u32 %v3892_v0, %v2623_v1 }
  0x3b   :  { %543 = vmatpush.bf16.msrb.mxu2 %v2706_v8  ;;  %v4015_v5 = vld [vmem:[#allocation5 + $0x1dc] sm:$0xf0]  ;;  %v2754_v11 = vor.u32 %v3924_v2, %v2751_v3  ;;  %vm2579_vm0 = vcmask 1041408   ;;  %vm2603_vm1 = vcmask 1024  }
  0x3c   :  { %556 = vmatpush.bf16.msrb.mxu3 %v2834_v12  ;;  %v3349_v7 = vld [vmem:[#allocation5 + $0x3c0] sm:$0xf]  ;;  %v3094_v12 = vor.u32 %v4015_v5, %v3093_v4 }
  0x3d   :  { %518 = vmatpush.bf16.msrb.mxu0 %v2686_v18  ;;  %v4079_v8 = vld [vmem:[#allocation5 + $0x3dc] sm:$0xf0] }
  0x3e   :  { %531 = vmatpush.bf16.msrb.mxu1 %v2814_v19  ;;  %v3605_v13 = vld [vmem:[#allocation5 + $0x5c0] sm:$0xf]  ;;  %v3350_v17 = vor.u32 %v4079_v8, %v3349_v7 }
  0x3f   :  { %544 = vmatpush.bf16.msrb.mxu2 %v2690_v20  ;;  %v4143_v14 = vld [vmem:[#allocation5 + $0x5dc] sm:$0xf0] }
  0x40   :  { %557 = vmatpush.bf16.msrb.mxu3 %v2818_v24  ;;  %v3061_v15 = vld [vmem:[#allocation5 + $0x180] sm:$0xf]  ;;  %v3606_v20 = vor.u32 %v4143_v14, %v3605_v13  ;;  %v4011_v14 = vld [vmem:[#allocation5 + $0x1c4] sm:$0xf] }
  0x41   :  { %519 = vmatpush.bf16.msrb.mxu0 %v2670_v30  ;;  %v4007_v16 = vld [vmem:[#allocation5 + $0x19c] sm:$0xf0] }
  0x42   :  { %532 = vmatpush.bf16.msrb.mxu1 %v2798_v31  ;;  %v3317_v18 = vld [vmem:[#allocation5 + $0x380] sm:$0xf]  ;;  %v3062_v21 = vor.u32 %v4007_v16, %v3061_v15  ;;  %v3095_v16 = vld [vmem:[#allocation5 + $0x1e0] sm:$0xf0] }
  0x43   :  { %545 = vmatpush.bf16.msrb.mxu2 %v2674_v32  ;;  %v4071_v19 = vld [vmem:[#allocation5 + $0x39c] sm:$0xf0] }
  0x44   :  { %558 = vmatpush.bf16.msrb.mxu3 %v2802_v36  ;;  %v3573_v22 = vld [vmem:[#allocation5 + $0x580] sm:$0xf]  ;;  %v3318_v26 = vor.u32 %v4071_v19, %v3317_v18  ;;  %v4075_v19 = vld [vmem:[#allocation5 + $0x3c4] sm:$0xf] }
  0x45   :  { %520 = vmatpush.bf16.msrb.mxu0 %v2654_v42  ;;  %v4135_v23 = vld [vmem:[#allocation5 + $0x59c] sm:$0xf0] }
  0x46   :  { %533 = vmatpush.bf16.msrb.mxu1 %v2782_v43  ;;  %v3029_v24 = vld [vmem:[#allocation5 + $0x140] sm:$0xf]  ;;  %v3574_v31 = vor.u32 %v4135_v23, %v3573_v22  ;;  %v3098_v22 = vor.u32 %v4011_v14, %v3095_v16 }
  0x47   :  { %546 = vmatpush.bf16.msrb.mxu2 %v2658_v44  ;;  %v3999_v25 = vld [vmem:[#allocation5 + $0x15c] sm:$0xf0] }
  0x48   :  { %559 = vmatpush.bf16.msrb.mxu3 %v2786_v48  ;;  %v3861_v27 = vld [vmem:[#allocation5 + $0x7c0] sm:$0xf]  ;;  %v3030_v33 = vor.u32 %v3999_v25, %v3029_v24  ;;  %v4003_v24 = vld [vmem:[#allocation5 + $0x184] sm:$0xf] }
  0x49   :  { %521 = vmatpush.bf16.msrb.mxu0 %v2638_v54  ;;  %v3285_v28 = vld [vmem:[#allocation5 + $0x340] sm:$0xf]  ;;  %v3063_v25 = vld [vmem:[#allocation5 + $0x1a0] sm:$0xf0] }
  0x4a   :  { %534 = vmatpush.bf16.msrb.mxu1 %v2766_v58  ;;  %v4063_v29 = vld [vmem:[#allocation5 + $0x35c] sm:$0xf0] }
  0x4b   :  { %547 = vmatpush.bf16.msrb.mxu2 %v2642_v59  ;;  %v4207_v30 = vld [vmem:[#allocation5 + $0x7dc] sm:$0xf0]  ;;  %v3286_v38 = vor.u32 %v4063_v29, %v3285_v28  ;;  %v3319_v28 = vld [vmem:[#allocation5 + $0x3a0] sm:$0xf0]  ;;  %v3066_v29 = vor.u32 %v4003_v24, %v3063_v25 }
  0x4c   :  { %560 = vmatpush.bf16.msrb.mxu3 %v2770_v63  ;;  %v3862_v32 = vor.u32 %v4207_v30, %v3861_v27  ;;  %v2997_v34 = vld [vmem:[#allocation5 + $0x100] sm:$0xf]  ;;  %v4067_v27 = vld [vmem:[#allocation5 + $0x384] sm:$0xf] }
  0x4d   :  { %522 = vmatpush.bf16.msrb.mxu0 %v2622_v6  ;;  %v3541_v35 = vld [vmem:[#allocation5 + $0x540] sm:$0xf]  ;;  %v3995_v30 = vld [vmem:[#allocation5 + $0x144] sm:$0xf] }
  0x4e   :  { %535 = vmatpush.bf16.msrb.mxu1 %v2750_v9  ;;  %v4127_v36 = vld [vmem:[#allocation5 + $0x55c] sm:$0xf0] }
  0x4f   :  { %548 = vmatpush.bf16.msrb.mxu2 %v2626_v10  ;;  %v3991_v37 = vld [vmem:[#allocation5 + $0x11c] sm:$0xf0]  ;;  %v3542_v43 = vor.u32 %v4127_v36, %v3541_v35  ;;  %v3987_v36 = vld [vmem:[#allocation5 + $0x104] sm:$0xf] }
  0x50   :  { %561 = vmatpush.bf16.msrb.mxu3 %v2754_v11  ;;  %523 = vmatmul.bf16.vlgmr.msrb.gmra.mxu0 %v4330_v56  ;;  %v3829_v39 = vld [vmem:[#allocation5 + $0x780] sm:$0xf] }
  0x51   :  { %2129 = vmatpush.bf16.msra.mxu0 %v3094_v12  ;;  %536 = vmatmul.bf16.vlgmr.msrb.gmra.mxu1 %v4332_v57  ;;  %v4199_v40 = vld [vmem:[#allocation5 + $0x79c] sm:$0xf0] }
  0x52   :  { %2142 = vmatpush.bf16.msra.mxu1 %v3350_v17  ;;  %549 = vmatmul.bf16.vlgmr.msrb.gmra.mxu2 %v4330_v56  ;;  %v3253_v56 = vld [vmem:[#allocation5 + $0x300] sm:$0xf]  ;;  %v3830_v42 = vor.u32 %v4199_v40, %v3829_v39  ;;  %v4051_v39 = vld [vmem:[#allocation5 + $0x304] sm:$0xf] }
  0x53   :  { %562 = vmatmul.bf16.vlgmr.msrb.gmra.mxu3 %v4332_v57  ;;  %2155 = vmatpush.bf16.msra.mxu2 %v3606_v20  ;;  %v4055_v41 = vld [vmem:[#allocation5 + $0x31c] sm:$0xf0]  ;;  %v2998_v57 = vor.u32 %v3991_v37, %v2997_v34  ;;  %v3351_v20 = vld [vmem:[#allocation5 + $0x3e0] sm:$0xf0] }
  0x54   :  { %2168 = vmatpush.bf16.msra.mxu3 %v3862_v32  ;;  %v2965_v44 = vld [vmem:[#allocation5 + $0xc0] sm:$0xf]  ;;  %v3254_v48 = vor.u32 %v4055_v41, %v3253_v56  ;;  %v3322_v32 = vor.u32 %v4067_v27, %v3319_v28  ;;  %v3287_v34 = vld [vmem:[#allocation5 + $0x360] sm:$0xf0] }
  0x55   :  { %2130 = vmatpush.bf16.msra.mxu0 %v3062_v21  ;;  %v3509_v45 = vld [vmem:[#allocation5 + $0x500] sm:$0xf]  ;;  %v2999_v37 = vld [vmem:[#allocation5 + $0x120] sm:$0xf0] }
  0x56   :  { %2143 = vmatpush.bf16.msra.mxu1 %v3318_v26  ;;  %v4119_v46 = vld [vmem:[#allocation5 + $0x51c] sm:$0xf0]  ;;  %v3354_v26 = vor.u32 %v4075_v19, %v3351_v20  ;;  %v3255_v40 = vld [vmem:[#allocation5 + $0x320] sm:$0xf0]  ;;  %v3002_v56 = vor.u32 %v3987_v36, %v2999_v37 }
  0x57   :  { %2156 = vmatpush.bf16.msra.mxu2 %v3574_v31  ;;  %v3983_v47 = vld [vmem:[#allocation5 + $0xdc] sm:$0xf0]  ;;  %v3510_v54 = vor.u32 %v4119_v46, %v3509_v45  ;;  %v3031_v31 = vld [vmem:[#allocation5 + $0x160] sm:$0xf0] }
  0x58   :  { %2169 = vmatpush.bf16.msra.mxu3 %v3830_v42  ;;  %v3797_v49 = vld [vmem:[#allocation5 + $0x740] sm:$0xf]  ;;  %v2966_v55 = vor.u32 %v3983_v47, %v2965_v44  ;;  %v3034_v35 = vor.u32 %v3995_v30, %v3031_v31  ;;  %v3979_v41 = vld [vmem:[#allocation5 + $0xc4] sm:$0xf] }
  0x59   :  { %2131 = vmatpush.bf16.msra.mxu0 %v3030_v33  ;;  %v4191_v50 = vld [vmem:[#allocation5 + $0x75c] sm:$0xf0]  ;;  %v4059_v33 = vld [vmem:[#allocation5 + $0x344] sm:$0xf] }
  0x5a   :  { %2144 = vmatpush.bf16.msra.mxu1 %v3286_v38  ;;  %v3221_v51 = vld [vmem:[#allocation5 + $0x2c0] sm:$0xf]  ;;  %v3798_v53 = vor.u32 %v4191_v50, %v3797_v49  ;;  %v3290_v38 = vor.u32 %v4059_v33, %v3287_v34  ;;  %v2967_v42 = vld [vmem:[#allocation5 + $0xe0] sm:$0xf0] }
  0x5b   :  { %v4047_v52 = vld [vmem:[#allocation5 + $0x2dc] sm:$0xf0]  ;;  %2157 = vmatpush.bf16.msra.mxu2 %v3542_v43  ;;  %v3258_v43 = vor.u32 %v4051_v39, %v3255_v40  ;;  %v3971_v46 = vld [vmem:[#allocation5 + $0x84] sm:$0xf] }
  0x5c   :  { %v2933_v58 = vld [vmem:[#allocation5 + $0x80] sm:$0xf]  ;;  %v3222_v62 = vor.u32 %v4047_v52, %v3221_v51  ;;  %2170 = vmatpush.bf16.msra.mxu3 %v3798_v53  ;;  %v4043_v52 = vld [vmem:[#allocation5 + $0x2c4] sm:$0xf] }
  0x5d   :  { %2132 = vmatpush.bf16.msra.mxu0 %v2998_v57  ;;  %v3477_v59 = vld [vmem:[#allocation5 + $0x4c0] sm:$0xf]  ;;  %v2970_v57 = vor.u32 %v3979_v41, %v2967_v42  ;;  %v3159_v19 = vld [vmem:[#allocation5 + $0x260] sm:$0xf0] }
  0x5e   :  { %v4111_v60 = vld [vmem:[#allocation5 + $0x4dc] sm:$0xf0]  ;;  %2145 = vmatpush.bf16.msra.mxu1 %v3254_v48  ;;  %v2935_v48 = vld [vmem:[#allocation5 + $0xa0] sm:$0xf0] }
  0x5f   :  { %v3975_v61 = vld [vmem:[#allocation5 + $0x9c] sm:$0xf0]  ;;  %2158 = vmatpush.bf16.msra.mxu2 %v3510_v54  ;;  %v3478_v4 = vor.u32 %v4111_v60, %v3477_v59  ;;  %v2938_v49 = vor.u32 %v3971_v46, %v2935_v48  ;;  %v3223_v54 = vld [vmem:[#allocation5 + $0x2e0] sm:$0xf0]  ;;  %v4345_v46 = vld [vmem:[%s4442_s2] sm:$0xf] }
  0x60   :  { %v3765_v63 = vld [vmem:[#allocation5 + $0x700] sm:$0xf]  ;;  %v2934_v5 = vor.u32 %v3975_v61, %v2933_v58  ;;  %v3963_v60 = vld [vmem:[#allocation5 + $0x44] sm:$0xf] }
  0x61   :  { %v4183_v0 = vld [vmem:[#allocation5 + $0x71c] sm:$0xf0]  ;;  %2133 = vmatpush.bf16.msra.mxu0 %v2966_v55  ;;  %v3226_v55 = vor.u32 %v4043_v52, %v3223_v54  ;;  %v4019_v27 = vld [vmem:[#allocation5 + $0x204] sm:$0xf]  ;;  %v135_v52 = vperm.slane %v4345_v46, 0 }
  0x62   :  { %v3189_v1 = vld [vmem:[#allocation5 + $0x280] sm:$0xf]  ;;  %v3766_v3 = vor.u32 %v4183_v0, %v3765_v63  ;;  %2146 = vmatpush.bf16.msra.mxu1 %v3222_v62  ;;  %v2903_v62 = vld [vmem:[#allocation5 + $0x60] sm:$0xf0] }
  0x63   :  { %v4039_v2 = vld [vmem:[#allocation5 + $0x29c] sm:$0xf0]  ;;  %2159 = vmatpush.bf16.msra.mxu2 %v3478_v4  ;;  %v2906_v63 = vor.u32 %v3963_v60, %v2903_v62  ;;  %v3191_v4 = vld [vmem:[#allocation5 + $0x2a0] sm:$0xf0] }
  0x64   :  { %v2901_v6 = vld [vmem:[#allocation5 + $0x40] sm:$0xf]  ;;  %v3190_v8 = vor.u32 %v4039_v2, %v3189_v1  ;;  %2171 = vmatpush.bf16.msra.mxu3 %v3766_v3  ;;  %v4035_v2 = vld [vmem:[#allocation5 + $0x284] sm:$0xf] }
  0x65   :  { %v3967_v7 = vld [vmem:[#allocation5 + $0x5c] sm:$0xf0]  ;;  %2134 = vmatpush.bf16.msra.mxu0 %v2934_v5  ;;  %v3194_v5 = vor.u32 %v4035_v2, %v3191_v4  ;;  %v3127_v28 = vld [vmem:[#allocation5 + $0x220] sm:$0xf0]  ;;  %v3101_v4 = vld [vmem:[#allocation5 + $0x1c8] sm:$0xf] }
  0x66   :  { %v3157_v9 = vld [vmem:[#allocation5 + $0x240] sm:$0xf]  ;;  %v2902_v11 = vor.u32 %v3967_v7, %v2901_v6  ;;  %2147 = vmatpush.bf16.msra.mxu1 %v3190_v8  ;;  %v3130_v30 = vor.u32 %v4019_v27, %v3127_v28  ;;  %v3863_v31 = vld [vmem:[#allocation5 + $0x7e0] sm:$0xf0]  ;;  %v4080_v27 = vld [vmem:[#allocation5 + $0x3e4] sm:$0xf0] }
  0x67   :  { %v4031_v10 = vld [vmem:[#allocation5 + $0x25c] sm:$0xf0]  ;;  %v4123_v33 = vld [vmem:[#allocation5 + $0x544] sm:$0xf] }
  0x68   :  { %v2869_v12 = vld [vmem:[#allocation5] sm:$0xf]  ;;  %v3158_v15 = vor.u32 %v4031_v10, %v3157_v9  ;;  %v3955_v9 = vld [vmem:[#allocation5 + $0x4] sm:$0xf] }
  0x69   :  { %v3959_v13 = vld [vmem:[#allocation5 + $0x1c] sm:$0xf0]  ;;  %2135 = vmatpush.bf16.msra.mxu0 %v2902_v11  ;;  %v2871_v10 = vld [vmem:[#allocation5 + $0x20] sm:$0xf0] }
  0x6a   :  { %v3125_v17 = vld [vmem:[#allocation5 + $0x200] sm:$0xf]  ;;  %v2870_v21 = vor.u32 %v3959_v13, %v2869_v12  ;;  %2148 = vmatpush.bf16.msra.mxu1 %v3158_v15  ;;  %v4139_v11 = vld [vmem:[#allocation5 + $0x5c4] sm:$0xf]  ;;  %v2874_v12 = vor.u32 %v3955_v9, %v2871_v10 }
  0x6b   :  { %v4023_v18 = vld [vmem:[#allocation5 + $0x21c] sm:$0xf0]  ;;  %v3607_v13 = vld [vmem:[#allocation5 + $0x5e0] sm:$0xf0] }
  0x6c   :  { %v3126_v23 = vor.u32 %v4023_v18, %v3125_v17  ;;  %v3445_v44 = vld [vmem:[#allocation5 + $0x480] sm:$0xf]  ;;  %v3610_v14 = vor.u32 %v4139_v11, %v3607_v13  ;;  %v4027_v17 = vld [vmem:[#allocation5 + $0x244] sm:$0xf]  ;;  %v3069_v13 = vld [vmem:[#allocation5 + $0x188] sm:$0xf] }
  0x6d   :  { %2136 = vmatpush.bf16.msra.mxu0 %v2870_v21  ;;  %v4103_v45 = vld [vmem:[#allocation5 + $0x49c] sm:$0xf0]  ;;  %v3162_v20 = vor.u32 %v4027_v17, %v3159_v19  ;;  %v4131_v21 = vld [vmem:[#allocation5 + $0x584] sm:$0xf] }
  0x6e   :  { %2149 = vmatpush.bf16.msra.mxu1 %v3126_v23  ;;  %v3446_v47 = vor.u32 %v4103_v45, %v3445_v44  ;;  %v3733_v50 = vld [vmem:[#allocation5 + $0x6c0] sm:$0xf]  ;;  %v3543_v34 = vld [vmem:[#allocation5 + $0x560] sm:$0xf0] }
  0x6f   :  { %v4175_v51 = vld [vmem:[#allocation5 + $0x6dc] sm:$0xf0]  ;;  %v4195_v36 = vld [vmem:[#allocation5 + $0x784] sm:$0xf] }
  0x70   :  { %2160 = vmatpush.bf16.msra.mxu2 %v3446_v47  ;;  %v3734_v53 = vor.u32 %v4175_v51, %v3733_v50  ;;  %v3413_v58 = vld [vmem:[#allocation5 + $0x440] sm:$0xf]  ;;  %v3831_v37 = vld [vmem:[#allocation5 + $0x7a0] sm:$0xf0] }
  0x71   :  { %2181 = vmatpush.bf16.msrb.mxu0 %v3098_v22  ;;  %v4095_v59 = vld [vmem:[#allocation5 + $0x45c] sm:$0xf0]  ;;  %v3575_v22 = vld [vmem:[#allocation5 + $0x5a0] sm:$0xf0] }
  0x72   :  { %2194 = vmatpush.bf16.msrb.mxu1 %v3354_v26  ;;  %2172 = vmatpush.bf16.msra.mxu3 %v3734_v53  ;;  %v3414_v61 = vor.u32 %v4095_v59, %v3413_v58  ;;  %v3701_v0 = vld [vmem:[#allocation5 + $0x680] sm:$0xf]  ;;  %v3578_v23 = vor.u32 %v4131_v21, %v3575_v22  ;;  %v4115_v39 = vld [vmem:[#allocation5 + $0x504] sm:$0xf] }
  0x73   :  { %v4167_v1 = vld [vmem:[#allocation5 + $0x69c] sm:$0xf0]  ;;  %v3511_v40 = vld [vmem:[#allocation5 + $0x520] sm:$0xf0] }
  0x74   :  { %2161 = vmatpush.bf16.msra.mxu2 %v3414_v61  ;;  %v3702_v3 = vor.u32 %v4167_v1, %v3701_v0  ;;  %v3381_v6 = vld [vmem:[#allocation5 + $0x400] sm:$0xf]  ;;  %v4187_v41 = vld [vmem:[#allocation5 + $0x744] sm:$0xf] }
  0x75   :  { %2182 = vmatpush.bf16.msrb.mxu0 %v3066_v29  ;;  %v4087_v7 = vld [vmem:[#allocation5 + $0x41c] sm:$0xf0]  ;;  %v4203_v29 = vld [vmem:[#allocation5 + $0x7c4] sm:$0xf] }
  0x76   :  { %2195 = vmatpush.bf16.msrb.mxu1 %v3322_v32  ;;  %2173 = vmatpush.bf16.msra.mxu3 %v3702_v3  ;;  %v3382_v8 = vor.u32 %v4087_v7, %v3381_v6  ;;  %v3669_v15 = vld [vmem:[#allocation5 + $0x640] sm:$0xf]  ;;  %v3866_v32 = vor.u32 %v4203_v29, %v3863_v31  ;;  %v3799_v42 = vld [vmem:[#allocation5 + $0x760] sm:$0xf0]  ;;  %v136_v7 = vperm.slane %v4345_v46, 1 }
  0x77   :  { %v4159_v16 = vld [vmem:[#allocation5 + $0x65c] sm:$0xf0]  ;;  %v3479_v44 = vld [vmem:[#allocation5 + $0x4e0] sm:$0xf0]  ;;  %v4000_v31 = vld [vmem:[#allocation5 + $0x164] sm:$0xf0] }
  0x78   :  { %2162 = vmatpush.bf16.msra.mxu2 %v3382_v8  ;;  %v3670_v18 = vor.u32 %v4159_v16, %v3669_v15  ;;  %v3637_v24 = vld [vmem:[#allocation5 + $0x600] sm:$0xf]  ;;  %v4179_v47 = vld [vmem:[#allocation5 + $0x704] sm:$0xf]  ;;  %v4008_v16 = vld [vmem:[#allocation5 + $0x1a4] sm:$0xf0] }
  0x79   :  { %2183 = vmatpush.bf16.msrb.mxu0 %v3034_v35  ;;  %v4151_v25 = vld [vmem:[#allocation5 + $0x61c] sm:$0xf0]  ;;  %v3546_v35 = vor.u32 %v4123_v33, %v3543_v34  ;;  %v3767_v48 = vld [vmem:[#allocation5 + $0x720] sm:$0xf0] }
  0x7a   :  { %2196 = vmatpush.bf16.msrb.mxu1 %v3290_v38  ;;  %2174 = vmatpush.bf16.msra.mxu3 %v3670_v18  ;;  %v3638_v26 = vor.u32 %v4151_v25, %v3637_v24  ;;  %v3834_v38 = vor.u32 %v4195_v36, %v3831_v37  ;;  %v4099_v50 = vld [vmem:[#allocation5 + $0x484] sm:$0xf]  ;;  %v3325_v37 = vld [vmem:[#allocation5 + $0x388] sm:$0xf] }
  0x7b   :  { %v3447_v51 = vld [vmem:[#allocation5 + $0x4a0] sm:$0xf0] }
  0x7c   :  { %2207 = vmatpush.bf16.msrb.mxu2 %v3610_v14  ;;  %v3450_v53 = vor.u32 %v4099_v50, %v3447_v51  ;;  %v4171_v54 = vld [vmem:[#allocation5 + $0x6c4] sm:$0xf]  ;;  %v3261_v50 = vld [vmem:[#allocation5 + $0x308] sm:$0xf] }
  0x7d   :  { %2184 = vmatpush.bf16.msrb.mxu0 %v3002_v56  ;;  %v3514_v56 = vor.u32 %v4115_v39, %v3511_v40  ;;  %v4091_v60 = vld [vmem:[#allocation5 + $0x444] sm:$0xf]  ;;  %v3005_v40 = vld [vmem:[#allocation5 + $0x108] sm:$0xf] }
  0x7e   :  { %2197 = vmatpush.bf16.msrb.mxu1 %v3258_v43  ;;  %2175 = vmatpush.bf16.msra.mxu3 %v3638_v26  ;;  %v3802_v43 = vor.u32 %v4187_v41, %v3799_v42  ;;  %v3415_v61 = vld [vmem:[#allocation5 + $0x460] sm:$0xf0]  ;;  %v3070_v26 = vor.u32 %v4008_v16, %v3069_v13  ;;  %v4056_v51 = vld [vmem:[#allocation5 + $0x324] sm:$0xf0]  ;;  %v138_v13 = vperm.slane %v4345_v46, 3 }
  0x7f   :  { %v3418_v0 = vor.u32 %v4091_v60, %v3415_v61  ;;  %v4163_v1 = vld [vmem:[#allocation5 + $0x684] sm:$0xf]  ;;  %v4048_v60 = vld [vmem:[#allocation5 + $0x2e4] sm:$0xf0] }
  0x80   :  { %2208 = vmatpush.bf16.msrb.mxu2 %v3578_v23  ;;  %v3703_v2 = vld [vmem:[#allocation5 + $0x6a0] sm:$0xf0]  ;;  %v3357_v23 = vld [vmem:[#allocation5 + $0x3c8] sm:$0xf] }
  0x81   :  { %2185 = vmatpush.bf16.msrb.mxu0 %v2970_v57  ;;  %v4107_v57 = vld [vmem:[#allocation5 + $0x4c4] sm:$0xf]  ;;  %v3706_v6 = vor.u32 %v4163_v1, %v3703_v2  ;;  %v3358_v34 = vor.u32 %v4080_v27, %v3357_v23  ;;  %v2909_v61 = vld [vmem:[#allocation5 + $0x48] sm:$0xf]  ;;  %v3071_v27 = vld [vmem:[#allocation5 + $0x1a8] sm:$0xf0] }
  0x82   :  { %2198 = vmatpush.bf16.msrb.mxu1 %v3226_v55  ;;  %2220 = vmatpush.bf16.msrb.mxu3 %v3866_v32  ;;  %v3482_v45 = vor.u32 %v4107_v57, %v3479_v44  ;;  %v3735_v55 = vld [vmem:[#allocation5 + $0x6e0] sm:$0xf0]  ;;  %v3293_v57 = vld [vmem:[#allocation5 + $0x348] sm:$0xf] }
  0x83   :  { %v3738_v58 = vor.u32 %v4171_v54, %v3735_v55  ;;  %v4083_v8 = vld [vmem:[#allocation5 + $0x404] sm:$0xf]  ;;  %v4064_v44 = vld [vmem:[#allocation5 + $0x364] sm:$0xf0]  ;;  %v3262_v54 = vor.u32 %v4056_v51, %v3261_v50  ;;  %v137_v55 = vperm.slane %v4345_v46, 2 }
  0x84   :  { %2209 = vmatpush.bf16.msrb.mxu2 %v3546_v35  ;;  %v3383_v9 = vld [vmem:[#allocation5 + $0x420] sm:$0xf0]  ;;  %v4200_v50 = vld [vmem:[#allocation5 + $0x7a4] sm:$0xf0] }
  0x85   :  { %2186 = vmatpush.bf16.msrb.mxu0 %v2938_v49  ;;  %v3770_v49 = vor.u32 %v4179_v47, %v3767_v48  ;;  %v3386_v11 = vor.u32 %v4083_v8, %v3383_v9  ;;  %v4155_v17 = vld [vmem:[#allocation5 + $0x644] sm:$0xf]  ;;  %v3984_v47 = vld [vmem:[#allocation5 + $0xe4] sm:$0xf0]  ;;  %v3294_v48 = vor.u32 %v4064_v44, %v3293_v57  ;;  %v3039_v57 = vld [vmem:[#allocation5 + $0x168] sm:$0xf0] }
  0x86   :  { %2199 = vmatpush.bf16.msrb.mxu1 %v3194_v5  ;;  %2221 = vmatpush.bf16.msrb.mxu3 %v3834_v38  ;;  %v4016_v5 = vld [vmem:[#allocation5 + $0x1e4] sm:$0xf0]  ;;  %v3671_v18 = vld [vmem:[#allocation5 + $0x660] sm:$0xf0] }
  0x87   :  { %v3674_v22 = vor.u32 %v4155_v17, %v3671_v18  ;;  %v4147_v28 = vld [vmem:[#allocation5 + $0x604] sm:$0xf]  ;;  %v4072_v38 = vld [vmem:[#allocation5 + $0x3a4] sm:$0xf0] }
  0x88   :  { %2210 = vmatpush.bf16.msrb.mxu2 %v3514_v56  ;;  %v3639_v29 = vld [vmem:[#allocation5 + $0x620] sm:$0xf0]  ;;  %v3992_v56 = vld [vmem:[#allocation5 + $0x124] sm:$0xf0]  ;;  %v3326_v42 = vor.u32 %v4072_v38, %v3325_v37 }
  0x89   :  { %2187 = vmatpush.bf16.msrb.mxu0 %v2906_v63  ;;  %v3642_v32 = vor.u32 %v4147_v28, %v3639_v29  ;;  %v3613_v8 = vld [vmem:[#allocation5 + $0x5c8] sm:$0xf] }
  0x8a   :  { %2200 = vmatpush.bf16.msrb.mxu1 %v3162_v20  ;;  %2222 = vmatpush.bf16.msrb.mxu3 %v3802_v43  ;;  %v3006_v43 = vor.u32 %v3992_v56, %v3005_v40  ;;  %v3165_v18 = vld [vmem:[#allocation5 + $0x248] sm:$0xf]  ;;  %v4076_v40 = vld [vmem:[#allocation5 + $0x3cc] sm:$0xf] }
  0x8b   :  { %v3359_v56 = vld [vmem:[#allocation5 + $0x3e8] sm:$0xf0] }
  0x8c   :  { %2211 = vmatpush.bf16.msrb.mxu2 %v3482_v45  ;;  %v2973_v45 = vld [vmem:[#allocation5 + $0xc8] sm:$0xf] }
  0x8d   :  { %2188 = vmatpush.bf16.msrb.mxu0 %v2874_v12  ;;  %v3102_v12 = vor.u32 %v4016_v5, %v3101_v4  ;;  %v3197_v4 = vld [vmem:[#allocation5 + $0x288] sm:$0xf] }
  0x8e   :  { %2201 = vmatpush.bf16.msrb.mxu1 %v3130_v30  ;;  %2223 = vmatpush.bf16.msrb.mxu3 %v3770_v49  ;;  %v3037_v30 = vld [vmem:[#allocation5 + $0x148] sm:$0xf]  ;;  %v2974_v49 = vor.u32 %v3984_v47, %v2973_v45 }
  0x8f   :  { %v3038_v36 = vor.u32 %v4000_v31, %v3037_v30  ;;  %v4040_v5 = vld [vmem:[#allocation5 + $0x2a4] sm:$0xf0] }
  0x90   :  { %2212 = vmatpush.bf16.msrb.mxu2 %v3450_v53  ;;  %v3976_v53 = vld [vmem:[#allocation5 + $0xa4] sm:$0xf0] }
  0x91   :  { %v3133_v31 = vld [vmem:[#allocation5 + $0x208] sm:$0xf] }
  0x92   :  { %2224 = vmatpush.bf16.msrb.mxu3 %v3738_v58 }
  0x94   :  { %2213 = vmatpush.bf16.msrb.mxu2 %v3418_v0 }
  0x96   :  { %2225 = vmatpush.bf16.msrb.mxu3 %v3706_v6  ;;  %v2877_v6 = vld [vmem:[#allocation5 + $0x8] sm:$0xf] }
  0x98   :  { %2214 = vmatpush.bf16.msrb.mxu2 %v3386_v11  ;;  %v4012_v11 = vld [vmem:[#allocation5 + $0x1cc] sm:$0xf] }
  0x9a   :  { %2226 = vmatpush.bf16.msrb.mxu3 %v3674_v22  ;;  %v3581_v22 = vld [vmem:[#allocation5 + $0x588] sm:$0xf] }
  0x9e   :  { %2227 = vmatpush.bf16.msrb.mxu3 %v3642_v32 }
  0xad   :  { %v472_v59 = vpop.f32.mrf.mxu0 }
  0xae   :  { %v473_v62 = vadd.f32 %v472_v59, %v135_v52  ;;  %v485_v63 = vpop.f32.mrf.mxu1  ;;  %v2941_v52 = vld [vmem:[#allocation5 + $0x88] sm:$0xf] }
  0xaf   :  { %v2942_v58 = vor.u32 %v3976_v53, %v2941_v52  ;;  %v3229_v59 = vld [vmem:[#allocation5 + $0x2c8] sm:$0xf] }
  0xb0   :  { %v486_v3 = vadd.f32 %v485_v63, %v473_v62  ;;  %v3968_v62 = vld [vmem:[#allocation5 + $0x64] sm:$0xf0]  ;;  %v3230_v0 = vor.u32 %v4048_v60, %v3229_v59 }
  0xb1   :  { %v4120_v60 = vld [vmem:[#allocation5 + $0x524] sm:$0xf0] }
  0xb2   :  { %v567_v10 = vmax.f32 %v486_v3, 0.0  ;;  %v2910_v3 = vor.u32 %v3968_v62, %v2909_v61  ;;  %v3988_v61 = vld [vmem:[#allocation5 + $0x10c] sm:$0xf] }
  0xb3   :  { %v3007_v62 = vld [vmem:[#allocation5 + $0x128] sm:$0xf0] }
  0xb4   :  { %v4349_v14 = vpack.c.bf16 %v567_v10, %v567_v10  ;;  %v4144_v10 = vld [vmem:[#allocation5 + $0x5e4] sm:$0xf0] }
  0xb5   :  { %v498_v15 = vpop.f32.mrf.mxu2  ;;  %v474_v21 = vpop.f32.mrf.mxu0 }
  0xb6   :  { %v499_v19 = vadd.f32 %v498_v15, %v136_v7  ;;  %v511_v20 = vpop.f32.mrf.mxu3  ;;  %2137 = vmatmul.bf16.vlgmr.msra.gmra.mxu0 %v4349_v14  ;;  %v487_v24 = vpop.f32.mrf.mxu1  ;;  %v3960_v7 = vld [vmem:[#allocation5 + $0x24] sm:$0xf0]  ;;  %v3198_v15 = vor.u32 %v4040_v5, %v3197_v4  ;;  %v3010_v4 = vor.u32 %v3988_v61, %v3007_v62  ;;  %v4028_v61 = vld [vmem:[#allocation5 + $0x24c] sm:$0xf] }
  0xb7   :  { %2233 = vmatpush.bf16.msra.mxu0 %v3102_v12  ;;  %v3103_v12 = vld [vmem:[#allocation5 + $0x1e8] sm:$0xf0]  ;;  %v2878_v17 = vor.u32 %v3960_v7, %v2877_v6  ;;  %v4192_v5 = vld [vmem:[#allocation5 + $0x764] sm:$0xf0] }
  0xb8   :  { %v512_v25 = vadd.f32 %v511_v20, %v499_v19  ;;  %v4032_v19 = vld [vmem:[#allocation5 + $0x264] sm:$0xf0]  ;;  %v3614_v20 = vor.u32 %v4144_v10, %v3613_v8  ;;  %v3106_v21 = vor.u32 %v4012_v11, %v3103_v12  ;;  %v4060_v6 = vld [vmem:[#allocation5 + $0x34c] sm:$0xf] }
  0xb9   :  { %v3166_v46 = vor.u32 %v4032_v19, %v3165_v18  ;;  %v3295_v7 = vld [vmem:[#allocation5 + $0x368] sm:$0xf0]  ;;  %v3485_v10 = vld [vmem:[#allocation5 + $0x4c8] sm:$0xf] }
  0xba   :  { %v568_v33 = vmax.f32 %v512_v25, 0.0  ;;  %v4136_v25 = vld [vmem:[#allocation5 + $0x5a4] sm:$0xf0]  ;;  %v3980_v8 = vld [vmem:[#allocation5 + $0xcc] sm:$0xf] }
  0xbb   :  { %2234 = vmatpush.bf16.msra.mxu0 %v3070_v26  ;;  %v4004_v26 = vld [vmem:[#allocation5 + $0x18c] sm:$0xf]  ;;  %v3582_v38 = vor.u32 %v4136_v25, %v3581_v22  ;;  %v4112_v11 = vld [vmem:[#allocation5 + $0x4e4] sm:$0xf0] }
  0xbc   :  { %v4352_v35 = vpack.c.bf16 %v568_v33, %v568_v33  ;;  %v4024_v33 = vld [vmem:[#allocation5 + $0x224] sm:$0xf0]  ;;  %v4052_v18 = vld [vmem:[#allocation5 + $0x30c] sm:$0xf] }
  0xbd   :  { %v500_v39 = vpop.f32.mrf.mxu2  ;;  %v3134_v45 = vor.u32 %v4024_v33, %v3133_v31  ;;  %v3263_v19 = vld [vmem:[#allocation5 + $0x328] sm:$0xf0]  ;;  %v4104_v25 = vld [vmem:[#allocation5 + $0x4a4] sm:$0xf0] }
  0xbe   :  { %2150 = vmatmul.bf16.vlgmr.msra.gmra.mxu1 %v4352_v35  ;;  %v513_v41 = vpop.f32.mrf.mxu3  ;;  %v3074_v39 = vor.u32 %v4004_v26, %v3071_v27  ;;  %v2943_v22 = vld [vmem:[#allocation5 + $0xa8] sm:$0xf0]  ;;  %v3266_v27 = vor.u32 %v4052_v18, %v3263_v19  ;;  %v3045_v19 = vld [vmem:[#allocation5 + $0x150] sm:$0xf] }
  0xbf   :  { %2246 = vmatpush.bf16.msra.mxu1 %v3358_v34  ;;  %2235 = vmatpush.bf16.msra.mxu0 %v3038_v36  ;;  %v3869_v34 = vld [vmem:[#allocation5 + $0x7c8] sm:$0xf]  ;;  %v3231_v31 = vld [vmem:[#allocation5 + $0x2e8] sm:$0xf0] }
  0xc0   :  { %v4208_v36 = vld [vmem:[#allocation5 + $0x7e4] sm:$0xf0]  ;;  %v3964_v33 = vld [vmem:[#allocation5 + $0x4c] sm:$0xf] }
  0xc1   :  { %v3549_v41 = vld [vmem:[#allocation5 + $0x548] sm:$0xf]  ;;  %v3870_v47 = vor.u32 %v4208_v36, %v3869_v34  ;;  %v2911_v34 = vld [vmem:[#allocation5 + $0x68] sm:$0xf0] }
  0xc2   :  { %v3421_v36 = vld [vmem:[#allocation5 + $0x448] sm:$0xf]  ;;  %v3167_v62 = vld [vmem:[#allocation5 + $0x268] sm:$0xf0] }
  0xc3   :  { %2247 = vmatpush.bf16.msra.mxu1 %v3326_v42  ;;  %2236 = vmatpush.bf16.msra.mxu0 %v3006_v43  ;;  %v4128_v42 = vld [vmem:[#allocation5 + $0x564] sm:$0xf0]  ;;  %v3996_v43 = vld [vmem:[#allocation5 + $0x14c] sm:$0xf] }
  0xc4   :  { %v3550_v52 = vor.u32 %v4128_v42, %v3549_v41  ;;  %v3042_v53 = vor.u32 %v3996_v43, %v3039_v57  ;;  %v4168_v41 = vld [vmem:[#allocation5 + $0x6a4] sm:$0xf0]  ;;  %v4036_v42 = vld [vmem:[#allocation5 + $0x28c] sm:$0xf] }
  0xc5   :  { %v3199_v43 = vld [vmem:[#allocation5 + $0x2a8] sm:$0xf0] }
  0xc6   :  { %2189 = vmatmul.bf16.vlgmr.msrb.gmra.mxu0 %v4349_v14 }
  0xc7   :  { %2248 = vmatpush.bf16.msra.mxu1 %v3294_v48  ;;  %2237 = vmatpush.bf16.msra.mxu0 %v2974_v49  ;;  %v3362_v48 = vor.u32 %v4076_v40, %v3359_v56  ;;  %v3837_v49 = vld [vmem:[#allocation5 + $0x788] sm:$0xf]  ;;  %v2914_v56 = vor.u32 %v3964_v33, %v2911_v34  ;;  %v3013_v33 = vld [vmem:[#allocation5 + $0x110] sm:$0xf] }
  0xc8   :  { %v3709_v40 = vld [vmem:[#allocation5 + $0x688] sm:$0xf]  ;;  %v3993_v34 = vld [vmem:[#allocation5 + $0x12c] sm:$0xf0] }
  0xcb   :  { %2249 = vmatpush.bf16.msra.mxu1 %v3262_v54  ;;  %2238 = vmatpush.bf16.msra.mxu0 %v2942_v58  ;;  %v4068_v54 = vld [vmem:[#allocation5 + $0x38c] sm:$0xf]  ;;  %v3517_v58 = vld [vmem:[#allocation5 + $0x508] sm:$0xf] }
  0xcd   :  { %v524_v63 = vpop.f32.mrf.mxu0 }
  0xce   :  { %v525_v1 = vadd.f32 %v524_v63, %v137_v55  ;;  %v537_v2 = vpop.f32.mrf.mxu1  ;;  %2202 = vmatmul.bf16.vlgmr.msrb.gmra.mxu1 %v4352_v35  ;;  %v3327_v55 = vld [vmem:[#allocation5 + $0x3a8] sm:$0xf0] }
  0xcf   :  { %2250 = vmatpush.bf16.msra.mxu1 %v3230_v0  ;;  %2239 = vmatpush.bf16.msra.mxu0 %v2910_v3  ;;  %v3838_v0 = vor.u32 %v4200_v50, %v3837_v49  ;;  %v3518_v3 = vor.u32 %v4120_v60, %v3517_v58  ;;  %v3109_v49 = vld [vmem:[#allocation5 + $0x1d0] sm:$0xf]  ;;  %v3677_v58 = vld [vmem:[#allocation5 + $0x648] sm:$0xf] }
  0xd0   :  { %v538_v9 = vadd.f32 %v537_v2, %v525_v1  ;;  %v3330_v1 = vor.u32 %v4068_v54, %v3327_v55  ;;  %v3805_v2 = vld [vmem:[#allocation5 + $0x748] sm:$0xf]  ;;  %v4017_v50 = vld [vmem:[#allocation5 + $0x1ec] sm:$0xf0]  ;;  %v4140_v54 = vld [vmem:[#allocation5 + $0x5cc] sm:$0xf] }
  0xd1   :  { %v3806_v12 = vor.u32 %v4192_v5, %v3805_v2  ;;  %v3615_v55 = vld [vmem:[#allocation5 + $0x5e8] sm:$0xf0]  ;;  %v4160_v60 = vld [vmem:[#allocation5 + $0x664] sm:$0xf0] }
  0xd2   :  { %v569_v16 = vmax.f32 %v538_v9, 0.0  ;;  %v2975_v9 = vld [vmem:[#allocation5 + $0xe8] sm:$0xf0]  ;;  %v3678_v5 = vor.u32 %v4160_v60, %v3677_v58  ;;  %v4057_v58 = vld [vmem:[#allocation5 + $0x32c] sm:$0xf0] }
  0xd3   :  { %2251 = vmatpush.bf16.msra.mxu1 %v3198_v15  ;;  %2240 = vmatpush.bf16.msra.mxu0 %v2878_v17  ;;  %v3773_v15 = vld [vmem:[#allocation5 + $0x708] sm:$0xf]  ;;  %v4132_v2 = vld [vmem:[#allocation5 + $0x58c] sm:$0xf]  ;;  %v2949_v60 = vld [vmem:[#allocation5 + $0x90] sm:$0xf] }
  0xd4   :  { %v4359_v23 = vpack.c.bf16 %v569_v16, %v569_v16  ;;  %v2978_v16 = vor.u32 %v3980_v8, %v2975_v9  ;;  %v4184_v17 = vld [vmem:[#allocation5 + $0x724] sm:$0xf0] }
  0xd5   :  { %v550_v24 = vpop.f32.mrf.mxu2  ;;  %v526_v30 = vpop.f32.mrf.mxu0  ;;  %v3774_v26 = vor.u32 %v4184_v17, %v3773_v15  ;;  %v3645_v8 = vld [vmem:[#allocation5 + $0x608] sm:$0xf]  ;;  %v3871_v15 = vld [vmem:[#allocation5 + $0x7e8] sm:$0xf0]  ;;  %v4081_v17 = vld [vmem:[#allocation5 + $0x3ec] sm:$0xf0] }
  0xd6   :  { %v551_v28 = vadd.f32 %v550_v24, %v138_v13  ;;  %v563_v29 = vpop.f32.mrf.mxu3  ;;  %v539_v32 = vpop.f32.mrf.mxu1  ;;  %2163 = vmatmul.bf16.vlgmr.msra.gmra.mxu2 %v4359_v23  ;;  %2241 = vmatmul.bf16.vlgmr.msra.gmra.mxu0 %v4349_v14  ;;  %v3298_v13 = vor.u32 %v4060_v6, %v3295_v7  ;;  %v3453_v24 = vld [vmem:[#allocation5 + $0x488] sm:$0xf]  ;;  %v3170_v6 = vor.u32 %v4028_v61, %v3167_v62  ;;  %v3583_v7 = vld [vmem:[#allocation5 + $0x5a8] sm:$0xf0]  ;;  %v3977_v61 = vld [vmem:[#allocation5 + $0xac] sm:$0xf0] }
  0xd7   :  { %2259 = vmatpush.bf16.msra.mxu2 %v3614_v20  ;;  %2285 = vmatpush.bf16.msrb.mxu0 %v3106_v21  ;;  %v3486_v20 = vor.u32 %v4112_v11, %v3485_v10  ;;  %v3972_v21 = vld [vmem:[#allocation5 + $0x8c] sm:$0xf]  ;;  %v4176_v30 = vld [vmem:[#allocation5 + $0x6e4] sm:$0xf0]  ;;  %v3454_v32 = vor.u32 %v4104_v25, %v3453_v24  ;;  %v3586_v18 = vor.u32 %v4132_v2, %v3583_v7 }
  0xd8   :  { %v564_v37 = vadd.f32 %v563_v29, %v551_v28  ;;  %2252 = vmatpush.bf16.msra.mxu1 %v3166_v46  ;;  %v3741_v28 = vld [vmem:[#allocation5 + $0x6c8] sm:$0xf]  ;;  %v2946_v29 = vor.u32 %v3972_v21, %v2943_v22  ;;  %v4044_v46 = vld [vmem:[#allocation5 + $0x2cc] sm:$0xf] }
  0xd9   :  { %v4152_v9 = vld [vmem:[#allocation5 + $0x624] sm:$0xf0]  ;;  %v4020_v10 = vld [vmem:[#allocation5 + $0x20c] sm:$0xf] }
  0xda   :  { %v570_v44 = vmax.f32 %v564_v37, 0.0  ;;  %v4096_v37 = vld [vmem:[#allocation5 + $0x464] sm:$0xf0]  ;;  %v3135_v11 = vld [vmem:[#allocation5 + $0x228] sm:$0xf0]  ;;  %v3646_v21 = vor.u32 %v4152_v9, %v3645_v8 }
  0xdb   :  { %2260 = vmatpush.bf16.msra.mxu2 %v3582_v38  ;;  %2286 = vmatpush.bf16.msrb.mxu0 %v3074_v39  ;;  %v3742_v38 = vor.u32 %v4176_v30, %v3741_v28  ;;  %v3234_v39 = vor.u32 %v4044_v46, %v3231_v31  ;;  %v3422_v57 = vor.u32 %v4096_v37, %v3421_v36  ;;  %v4124_v24 = vld [vmem:[#allocation5 + $0x54c] sm:$0xf]  ;;  %v3333_v46 = vld [vmem:[#allocation5 + $0x390] sm:$0xf] }
  0xdc   :  { %v4363_v51 = vpack.c.bf16 %v570_v44, %v570_v44  ;;  %2253 = vmatpush.bf16.msra.mxu1 %v3134_v45  ;;  %v3389_v44 = vld [vmem:[#allocation5 + $0x408] sm:$0xf]  ;;  %v3956_v45 = vld [vmem:[#allocation5 + $0xc] sm:$0xf]  ;;  %v3138_v22 = vor.u32 %v4020_v10, %v3135_v11  ;;  %v4073_v31 = vld [vmem:[#allocation5 + $0x3ac] sm:$0xf0] }
  0xdd   :  { %v552_v59 = vpop.f32.mrf.mxu2  ;;  %v3551_v25 = vld [vmem:[#allocation5 + $0x568] sm:$0xf0]  ;;  %v2917_v8 = vld [vmem:[#allocation5 + $0x50] sm:$0xf] }
  0xde   :  { %v565_v63 = vpop.f32.mrf.mxu3  ;;  %2176 = vmatmul.bf16.vlgmr.msra.gmra.mxu3 %v4363_v51  ;;  %v4196_v28 = vld [vmem:[#allocation5 + $0x78c] sm:$0xf]  ;;  %v3969_v9 = vld [vmem:[#allocation5 + $0x6c] sm:$0xf0] }
  0xdf   :  { %2272 = vmatpush.bf16.msra.mxu3 %v3870_v47  ;;  %2261 = vmatpush.bf16.msra.mxu2 %v3550_v52  ;;  %v2879_v47 = vld [vmem:[#allocation5 + $0x28] sm:$0xf0]  ;;  %v3710_v52 = vor.u32 %v4168_v41, %v3709_v40 }
  0xe0   :  { %2298 = vmatpush.bf16.msrb.mxu1 %v3362_v48  ;;  %2287 = vmatpush.bf16.msrb.mxu0 %v3042_v53  ;;  %v4088_v48 = vld [vmem:[#allocation5 + $0x424] sm:$0xf0]  ;;  %v3202_v53 = vor.u32 %v4036_v42, %v3199_v43  ;;  %v2882_v59 = vor.u32 %v3956_v45, %v2879_v47  ;;  %v3839_v30 = vld [vmem:[#allocation5 + $0x7a8] sm:$0xf0]  ;;  %v3301_v42 = vld [vmem:[#allocation5 + $0x350] sm:$0xf] }
  0xe1   :  { %2254 = vmatmul.bf16.vlgmr.msra.gmra.mxu1 %v4352_v35  ;;  %v3390_v63 = vor.u32 %v4088_v48, %v3389_v44  ;;  %v4116_v36 = vld [vmem:[#allocation5 + $0x50c] sm:$0xf]  ;;  %v4065_v43 = vld [vmem:[#allocation5 + $0x36c] sm:$0xf0] }
  0xe2   :  { %v3519_v37 = vld [vmem:[#allocation5 + $0x528] sm:$0xf0]  ;;  %v2981_v44 = vld [vmem:[#allocation5 + $0xd0] sm:$0xf] }
  0xe3   :  { %2273 = vmatpush.bf16.msra.mxu3 %v3838_v0  ;;  %2262 = vmatpush.bf16.msra.mxu2 %v3518_v3  ;;  %v3110_v0 = vor.u32 %v4017_v50, %v3109_v49  ;;  %v3077_v3 = vld [vmem:[#allocation5 + $0x190] sm:$0xf]  ;;  %v4188_v40 = vld [vmem:[#allocation5 + $0x74c] sm:$0xf]  ;;  %v3302_v50 = vor.u32 %v4065_v43, %v3301_v42 }
  0xe4   :  { %2299 = vmatpush.bf16.msrb.mxu1 %v3330_v1  ;;  %2288 = vmatpush.bf16.msrb.mxu0 %v3010_v4  ;;  %v3618_v1 = vor.u32 %v4140_v54, %v3615_v55  ;;  %v4009_v4 = vld [vmem:[#allocation5 + $0x1ac] sm:$0xf0]  ;;  %v3807_v41 = vld [vmem:[#allocation5 + $0x768] sm:$0xf0] }
  0xe5   :  { %v3985_v45 = vld [vmem:[#allocation5 + $0xec] sm:$0xf0]  ;;  %v4108_v47 = vld [vmem:[#allocation5 + $0x4cc] sm:$0xf]  ;;  %v3810_v49 = vor.u32 %v4188_v40, %v3807_v41  ;;  %v3079_v41 = vld [vmem:[#allocation5 + $0x1b0] sm:$0xf0] }
  0xe6   :  { %2215 = vmatmul.bf16.vlgmr.msrb.gmra.mxu2 %v4359_v23  ;;  %v3487_v48 = vld [vmem:[#allocation5 + $0x4e8] sm:$0xf0]  ;;  %v3269_v55 = vld [vmem:[#allocation5 + $0x310] sm:$0xf] }
  0xe7   :  { %2274 = vmatpush.bf16.msra.mxu3 %v3806_v12  ;;  %2263 = vmatpush.bf16.msra.mxu2 %v3486_v20  ;;  %v4204_v12 = vld [vmem:[#allocation5 + $0x7cc] sm:$0xf]  ;;  %v4001_v20 = vld [vmem:[#allocation5 + $0x16c] sm:$0xf0] }
  0xe8   :  { %2300 = vmatpush.bf16.msrb.mxu1 %v3298_v13  ;;  %2289 = vmatpush.bf16.msrb.mxu0 %v2978_v16  ;;  %v3078_v13 = vor.u32 %v4009_v4, %v3077_v3  ;;  %v3365_v16 = vld [vmem:[#allocation5 + $0x3d0] sm:$0xf]  ;;  %v3775_v54 = vld [vmem:[#allocation5 + $0x728] sm:$0xf0]  ;;  %v2950_v3 = vor.u32 %v3977_v61, %v2949_v60 }
  0xe9   :  { %v4100_v62 = vld [vmem:[#allocation5 + $0x48c] sm:$0xf]  ;;  %v3589_v40 = vld [vmem:[#allocation5 + $0x590] sm:$0xf] }
  0xea   :  { %v4172_v2 = vld [vmem:[#allocation5 + $0x6cc] sm:$0xf] }
  0xeb   :  { %2275 = vmatpush.bf16.msra.mxu3 %v3774_v26  ;;  %2264 = vmatpush.bf16.msra.mxu2 %v3454_v32  ;;  %v3874_v26 = vor.u32 %v4204_v12, %v3871_v15  ;;  %v3554_v32 = vor.u32 %v4124_v24, %v3551_v25  ;;  %v3743_v4 = vld [vmem:[#allocation5 + $0x6e8] sm:$0xf0]  ;;  %v3961_v24 = vld [vmem:[#allocation5 + $0x2c] sm:$0xf0] }
  0xec   :  { %2301 = vmatpush.bf16.msrb.mxu1 %v3266_v27  ;;  %2290 = vmatpush.bf16.msrb.mxu0 %v2946_v29  ;;  %v3366_v27 = vor.u32 %v4081_v17, %v3365_v16  ;;  %v3046_v29 = vor.u32 %v4001_v20, %v3045_v19  ;;  %v4092_v10 = vld [vmem:[#allocation5 + $0x44c] sm:$0xf]  ;;  %v3746_v12 = vor.u32 %v4172_v2, %v3743_v4  ;;  %v4041_v19 = vld [vmem:[#allocation5 + $0x2ac] sm:$0xf0] }
  0xed   :  { %v3423_v11 = vld [vmem:[#allocation5 + $0x468] sm:$0xf0]  ;;  %v2918_v16 = vor.u32 %v3969_v9, %v2917_v8  ;;  %v3845_v2 = vld [vmem:[#allocation5 + $0x790] sm:$0xf]  ;;  %v3015_v8 = vld [vmem:[#allocation5 + $0x130] sm:$0xf0] }
  0xee   :  { %2228 = vmatmul.bf16.vlgmr.msrb.gmra.mxu3 %v4363_v51  ;;  %v4164_v15 = vld [vmem:[#allocation5 + $0x68c] sm:$0xf]  ;;  %v3426_v20 = vor.u32 %v4092_v10, %v3423_v11  ;;  %v4201_v4 = vld [vmem:[#allocation5 + $0x7ac] sm:$0xf0] }
  0xef   :  { %2276 = vmatpush.bf16.msra.mxu3 %v3742_v38  ;;  %2265 = vmatpush.bf16.msra.mxu2 %v3422_v57  ;;  %v3842_v38 = vor.u32 %v4196_v28, %v3839_v30  ;;  %v3522_v57 = vor.u32 %v4116_v36, %v3519_v37  ;;  %v3711_v17 = vld [vmem:[#allocation5 + $0x6a8] sm:$0xf0]  ;;  %v3621_v30 = vld [vmem:[#allocation5 + $0x5d0] sm:$0xf]  ;;  %v3846_v10 = vor.u32 %v4201_v4, %v3845_v2  ;;  %v4141_v4 = vld [vmem:[#allocation5 + $0x5d4] sm:$0xf] }
  0xf0   :  { %2302 = vmatpush.bf16.msrb.mxu1 %v3234_v39  ;;  %2291 = vmatpush.bf16.msrb.mxu0 %v2914_v56  ;;  %v3334_v39 = vor.u32 %v4073_v31, %v3333_v46  ;;  %v3014_v56 = vor.u32 %v3993_v34, %v3013_v33  ;;  %v3391_v25 = vld [vmem:[#allocation5 + $0x428] sm:$0xf0]  ;;  %v3714_v28 = vor.u32 %v4164_v15, %v3711_v17  ;;  %v4145_v46 = vld [vmem:[#allocation5 + $0x5ec] sm:$0xf0] }
  0xf1   :  { %v4156_v31 = vld [vmem:[#allocation5 + $0x64c] sm:$0xf]  ;;  %v3173_v34 = vld [vmem:[#allocation5 + $0x250] sm:$0xf] }
  0xf2   :  { %v3679_v33 = vld [vmem:[#allocation5 + $0x668] sm:$0xf0]  ;;  %v4033_v36 = vld [vmem:[#allocation5 + $0x26c] sm:$0xf0] }
  0xf3   :  { %2277 = vmatpush.bf16.msra.mxu3 %v3710_v52  ;;  %2266 = vmatpush.bf16.msra.mxu2 %v3390_v63  ;;  %v4180_v52 = vld [vmem:[#allocation5 + $0x70c] sm:$0xf]  ;;  %v3682_v42 = vor.u32 %v4156_v31, %v3679_v33  ;;  %v3174_v43 = vor.u32 %v4033_v36, %v3173_v34  ;;  %v3813_v15 = vld [vmem:[#allocation5 + $0x750] sm:$0xf]  ;;  %v3271_v31 = vld [vmem:[#allocation5 + $0x330] sm:$0xf0] }
  0xf4   :  { %2303 = vmatpush.bf16.msrb.mxu1 %v3202_v53  ;;  %2292 = vmatpush.bf16.msrb.mxu0 %v2882_v59  ;;  %v2982_v53 = vor.u32 %v3985_v45, %v2981_v44  ;;  %v3490_v59 = vor.u32 %v4108_v47, %v3487_v48  ;;  %v3455_v63 = vld [vmem:[#allocation5 + $0x4a8] sm:$0xf0]  ;;  %v3141_v47 = vld [vmem:[#allocation5 + $0x210] sm:$0xf]  ;;  %v2951_v33 = vld [vmem:[#allocation5 + $0xb0] sm:$0xf0] }
  0xf5   :  { %v3458_v7 = vor.u32 %v4100_v62, %v3455_v63  ;;  %v4148_v44 = vld [vmem:[#allocation5 + $0x60c] sm:$0xf]  ;;  %v4025_v48 = vld [vmem:[#allocation5 + $0x22c] sm:$0xf0] }
  0xf6   :  { %2267 = vmatmul.bf16.vlgmr.msra.gmra.mxu2 %v4359_v23  ;;  %v3647_v45 = vld [vmem:[#allocation5 + $0x628] sm:$0xf0]  ;;  %v3142_v61 = vor.u32 %v4025_v48, %v3141_v47  ;;  %v4193_v17 = vld [vmem:[#allocation5 + $0x76c] sm:$0xf0] }
  0xf7   :  { %2311 = vmatpush.bf16.msrb.mxu2 %v3618_v1  ;;  %2278 = vmatpush.bf16.msra.mxu3 %v3678_v5  ;;  %v3270_v1 = vor.u32 %v4057_v58, %v3269_v55  ;;  %v3237_v5 = vld [vmem:[#allocation5 + $0x2d0] sm:$0xf]  ;;  %v3997_v58 = vld [vmem:[#allocation5 + $0x154] sm:$0xf]  ;;  %v3650_v60 = vor.u32 %v4148_v44, %v3647_v45 }
  0xf8   :  { %2337 = vmatpush.bf16.msra.mxu0 %v3110_v0  ;;  %2304 = vmatpush.bf16.msrb.mxu1 %v3170_v6  ;;  %v3778_v0 = vor.u32 %v4180_v52, %v3775_v54  ;;  %v4049_v6 = vld [vmem:[#allocation5 + $0x2ec] sm:$0xf0]  ;;  %v3367_v54 = vld [vmem:[#allocation5 + $0x3f0] sm:$0xf0] }
  0xf9   :  { %2293 = vmatmul.bf16.vlgmr.msrb.gmra.mxu0 %v4349_v14  ;;  %v4209_v52 = vld [vmem:[#allocation5 + $0x7ec] sm:$0xf0]  ;;  %v2919_v44 = vld [vmem:[#allocation5 + $0x70] sm:$0xf0] }
  0xfa   :  { %v3397_v2 = vld [vmem:[#allocation5 + $0x410] sm:$0xf] }
  0xfb   :  { %2312 = vmatpush.bf16.msrb.mxu2 %v3586_v18  ;;  %2279 = vmatpush.bf16.msra.mxu3 %v3646_v21  ;;  %v3205_v18 = vld [vmem:[#allocation5 + $0x290] sm:$0xf]  ;;  %v4084_v21 = vld [vmem:[#allocation5 + $0x40c] sm:$0xf] }
  0xfc   :  { %2338 = vmatpush.bf16.msra.mxu0 %v3078_v13  ;;  %2305 = vmatpush.bf16.msrb.mxu1 %v3138_v22  ;;  %v3238_v13 = vor.u32 %v4049_v6, %v3237_v5  ;;  %v2885_v22 = vld [vmem:[#allocation5 + $0x10] sm:$0xf]  ;;  %v3394_v37 = vor.u32 %v4084_v21, %v3391_v25  ;;  %v4069_v5 = vld [vmem:[#allocation5 + $0x394] sm:$0xf] }
  0xfd   :  { %v3335_v6 = vld [vmem:[#allocation5 + $0x3b0] sm:$0xf0] }
  0xfe   :  { %2280 = vmatmul.bf16.vlgmr.msra.gmra.mxu3 %v4363_v51  ;;  %v3338_v11 = vor.u32 %v4069_v5, %v3335_v6  ;;  %v2983_v21 = vld [vmem:[#allocation5 + $0xf0] sm:$0xf0] }
  0xff   :  { %2324 = vmatpush.bf16.msrb.mxu3 %v3874_v26  ;;  %2306 = vmatmul.bf16.vlgmr.msrb.gmra.mxu1 %v4352_v35  ;;  %v4013_v26 = vld [vmem:[#allocation5 + $0x1d4] sm:$0xf] }
 0x100   :  { %2350 = vmatpush.bf16.msra.mxu1 %v3366_v27  ;;  %2339 = vmatpush.bf16.msra.mxu0 %v3046_v29  ;;  %v3111_v27 = vld [vmem:[#allocation5 + $0x1f0] sm:$0xf0]  ;;  %v3206_v29 = vor.u32 %v4041_v19, %v3205_v18 }
 0x101   :  { %2313 = vmatpush.bf16.msrb.mxu2 %v3554_v32  ;;  %v2886_v32 = vor.u32 %v3961_v24, %v2885_v22  ;;  %v4061_v18 = vld [vmem:[#allocation5 + $0x354] sm:$0xf]  ;;  %v3814_v24 = vor.u32 %v4193_v17, %v3813_v15  ;;  %v4010_v15 = vld [vmem:[#allocation5 + $0x1b4] sm:$0xf0] }
 0x102   :  { %v3303_v19 = vld [vmem:[#allocation5 + $0x370] sm:$0xf0] }
 0x103   :  { %2325 = vmatpush.bf16.msrb.mxu3 %v3842_v38  ;;  %v3114_v38 = vor.u32 %v4013_v26, %v3111_v27  ;;  %v3306_v25 = vor.u32 %v4061_v18, %v3303_v19  ;;  %v3493_v26 = vld [vmem:[#allocation5 + $0x4d0] sm:$0xf]  ;;  %v3623_v6 = vld [vmem:[#allocation5 + $0x5f0] sm:$0xf0] }
 0x104   :  { %2351 = vmatpush.bf16.msra.mxu1 %v3334_v39  ;;  %2340 = vmatpush.bf16.msra.mxu0 %v3014_v56  ;;  %v3622_v39 = vor.u32 %v4145_v46, %v3621_v30  ;;  %v4005_v56 = vld [vmem:[#allocation5 + $0x194] sm:$0xf]  ;;  %v4113_v27 = vld [vmem:[#allocation5 + $0x4ec] sm:$0xf0] }
 0x105   :  { %2314 = vmatpush.bf16.msrb.mxu2 %v3522_v57  ;;  %v4137_v57 = vld [vmem:[#allocation5 + $0x5ac] sm:$0xf0]  ;;  %v4053_v46 = vld [vmem:[#allocation5 + $0x314] sm:$0xf]  ;;  %v3494_v34 = vor.u32 %v4113_v27, %v3493_v26 }
 0x106   :  { %v3590_v55 = vor.u32 %v4137_v57, %v3589_v40  ;;  %v4185_v30 = vld [vmem:[#allocation5 + $0x72c] sm:$0xf0]  ;;  %v3965_v57 = vld [vmem:[#allocation5 + $0x54] sm:$0xf] }
 0x107   :  { %2326 = vmatpush.bf16.msrb.mxu3 %v3810_v49  ;;  %v3877_v49 = vld [vmem:[#allocation5 + $0x7d0] sm:$0xf]  ;;  %v4133_v18 = vld [vmem:[#allocation5 + $0x594] sm:$0xf] }
 0x108   :  { %2352 = vmatpush.bf16.msra.mxu1 %v3302_v50  ;;  %2341 = vmatpush.bf16.msra.mxu0 %v2982_v53  ;;  %v3082_v50 = vor.u32 %v4005_v56, %v3079_v41  ;;  %v4077_v53 = vld [vmem:[#allocation5 + $0x3d4] sm:$0xf]  ;;  %v3878_v62 = vor.u32 %v4209_v52, %v3877_v49  ;;  %v3749_v40 = vld [vmem:[#allocation5 + $0x6d0] sm:$0xf] }
 0x109   :  { %2315 = vmatpush.bf16.msrb.mxu2 %v3490_v59  ;;  %v3047_v59 = vld [vmem:[#allocation5 + $0x170] sm:$0xf0]  ;;  %v3370_v63 = vor.u32 %v4077_v53, %v3367_v54  ;;  %v4177_v41 = vld [vmem:[#allocation5 + $0x6ec] sm:$0xf0]  ;;  %v2922_v53 = vor.u32 %v3965_v57, %v2919_v44  ;;  %v4074_v57 = vld [vmem:[#allocation5 + $0x3b4] sm:$0xf0] }
 0x10a   :  { %v3750_v47 = vor.u32 %v4177_v41, %v3749_v40  ;;  %v3429_v49 = vld [vmem:[#allocation5 + $0x450] sm:$0xf]  ;;  %v3591_v19 = vld [vmem:[#allocation5 + $0x5b0] sm:$0xf0]  ;;  %v3021_v44 = vld [vmem:[#allocation5 + $0x118] sm:$0xf] }
 0x10b   :  { %2327 = vmatpush.bf16.msrb.mxu3 %v3778_v0  ;;  %v3557_v0 = vld [vmem:[#allocation5 + $0x550] sm:$0xf]  ;;  %v4205_v27 = vld [vmem:[#allocation5 + $0x7d4] sm:$0xf] }
 0x10c   :  { %2353 = vmatpush.bf16.msra.mxu1 %v3270_v1  ;;  %2342 = vmatpush.bf16.msra.mxu0 %v2950_v3  ;;  %v4129_v1 = vld [vmem:[#allocation5 + $0x56c] sm:$0xf0]  ;;  %v3050_v3 = vor.u32 %v3997_v58, %v3047_v59  ;;  %v3207_v58 = vld [vmem:[#allocation5 + $0x2b0] sm:$0xf0] }
 0x10d   :  { %2316 = vmatpush.bf16.msrb.mxu2 %v3458_v7  ;;  %v3989_v7 = vld [vmem:[#allocation5 + $0x114] sm:$0xf]  ;;  %v3558_v9 = vor.u32 %v4129_v1, %v3557_v0  ;;  %v3717_v52 = vld [vmem:[#allocation5 + $0x690] sm:$0xf] }
 0x10e   :  { %v4169_v54 = vld [vmem:[#allocation5 + $0x6ac] sm:$0xf0]  ;;  %v3957_v59 = vld [vmem:[#allocation5 + $0x14] sm:$0xf] }
 0x10f   :  { %2328 = vmatpush.bf16.msrb.mxu3 %v3746_v12  ;;  %v3525_v12 = vld [vmem:[#allocation5 + $0x510] sm:$0xf]  ;;  %v3718_v0 = vor.u32 %v4169_v54, %v3717_v52  ;;  %v4382_v41 = vld [vmem:[%s4444_s4] sm:$0xff] }
 0x110   :  { %2354 = vmatpush.bf16.msra.mxu1 %v3238_v13  ;;  %2343 = vmatpush.bf16.msra.mxu0 %v2918_v16  ;;  %v4121_v13 = vld [vmem:[#allocation5 + $0x52c] sm:$0xf0]  ;;  %v3018_v16 = vor.u32 %v3989_v7, %v3015_v8  ;;  %v3527_v52 = vld [vmem:[#allocation5 + $0x530] sm:$0xf0] }
 0x111   :  { %2317 = vmatpush.bf16.msrb.mxu2 %v3426_v20  ;;  %v3981_v20 = vld [vmem:[#allocation5 + $0xd4] sm:$0xf]  ;;  %v3526_v22 = vor.u32 %v4121_v13, %v3525_v12  ;;  %v3685_v7 = vld [vmem:[#allocation5 + $0x650] sm:$0xf]  ;;  %v3085_v13 = vld [vmem:[#allocation5 + $0x198] sm:$0xf] }
 0x112   :  { %v4161_v8 = vld [vmem:[#allocation5 + $0x66c] sm:$0xf0]  ;;  %v3086_v26 = vor.u32 %v4010_v15, %v3085_v13 }
 0x113   :  { %2329 = vmatpush.bf16.msrb.mxu3 %v3714_v28  ;;  %v3781_v28 = vld [vmem:[#allocation5 + $0x710] sm:$0xf]  ;;  %v3686_v17 = vor.u32 %v4161_v8, %v3685_v7  ;;  %v4181_v7 = vld [vmem:[#allocation5 + $0x714] sm:$0xf] }
 0x114   :  { %2355 = vmatpush.bf16.msra.mxu1 %v3206_v29  ;;  %2344 = vmatpush.bf16.msra.mxu0 %v2886_v32  ;;  %v2986_v29 = vor.u32 %v3981_v20, %v2983_v21  ;;  %v3973_v32 = vld [vmem:[#allocation5 + $0x94] sm:$0xf]  ;;  %v3782_v36 = vor.u32 %v4185_v30, %v3781_v28  ;;  %v3653_v20 = vld [vmem:[#allocation5 + $0x610] sm:$0xf]  ;;  %v4082_v30 = vld [vmem:[#allocation5 + $0x3f4] sm:$0xf0] }
 0x115   :  { %2318 = vmatpush.bf16.msrb.mxu2 %v3394_v37  ;;  %v3274_v37 = vor.u32 %v4053_v46, %v3271_v31  ;;  %v2954_v56 = vor.u32 %v3973_v32, %v2951_v33  ;;  %v3879_v28 = vld [vmem:[#allocation5 + $0x7f0] sm:$0xf0]  ;;  %v3053_v46 = vld [vmem:[#allocation5 + $0x158] sm:$0xf]  ;;  %v3594_v32 = vor.u32 %v4133_v18, %v3591_v19 }
 0x116   :  { %v4002_v31 = vld [vmem:[#allocation5 + $0x174] sm:$0xf0]  ;;  %v3783_v8 = vld [vmem:[#allocation5 + $0x730] sm:$0xf0] }
 0x117   :  { %2330 = vmatpush.bf16.msrb.mxu3 %v3682_v42  ;;  %2345 = vmatmul.bf16.vlgmr.msra.gmra.mxu0 %v4349_v14  ;;  %v4045_v42 = vld [vmem:[#allocation5 + $0x2d4] sm:$0xf] }
 0x118   :  { %2389 = vmatpush.bf16.msrb.mxu0 %v3114_v38  ;;  %2356 = vmatpush.bf16.msra.mxu1 %v3174_v43  ;;  %v3461_v38 = vld [vmem:[#allocation5 + $0x490] sm:$0xf]  ;;  %v3239_v43 = vld [vmem:[#allocation5 + $0x2f0] sm:$0xf0] }
 0x119   :  { %2363 = vmatpush.bf16.msra.mxu2 %v3622_v39  ;;  %v4105_v39 = vld [vmem:[#allocation5 + $0x4ac] sm:$0xf0]  ;;  %v3242_v48 = vor.u32 %v4045_v42, %v3239_v43  ;;  %v3847_v42 = vld [vmem:[#allocation5 + $0x7b0] sm:$0xf0]  ;;  %v3341_v43 = vld [vmem:[#allocation5 + $0x398] sm:$0xf] }
 0x11a   :  { %2319 = vmatmul.bf16.vlgmr.msrb.gmra.mxu2 %v4359_v23  ;;  %v3462_v45 = vor.u32 %v4105_v39, %v3461_v38  ;;  %v3559_v38 = vld [vmem:[#allocation5 + $0x570] sm:$0xf0]  ;;  %v3342_v54 = vor.u32 %v4074_v57, %v3341_v43  ;;  %v4014_v43 = vld [vmem:[#allocation5 + $0x1dc] sm:$0xf] }
 0x11b   :  { %2331 = vmatpush.bf16.msrb.mxu3 %v3650_v60  ;;  %v2887_v60 = vld [vmem:[#allocation5 + $0x30] sm:$0xf0]  ;;  %v3119_v57 = vld [vmem:[#allocation5 + $0x1f8] sm:$0xf0] }
 0x11c   :  { %2390 = vmatpush.bf16.msrb.mxu0 %v3082_v50  ;;  %2357 = vmatpush.bf16.msra.mxu1 %v3142_v61  ;;  %v4097_v50 = vld [vmem:[#allocation5 + $0x46c] sm:$0xf0]  ;;  %v2890_v5 = vor.u32 %v3957_v59, %v2887_v60  ;;  %v4197_v39 = vld [vmem:[#allocation5 + $0x794] sm:$0xf]  ;;  %v3309_v60 = vld [vmem:[#allocation5 + $0x358] sm:$0xf] }
 0x11d   :  { %2364 = vmatpush.bf16.msra.mxu2 %v3590_v55  ;;  %v4037_v55 = vld [vmem:[#allocation5 + $0x294] sm:$0xf]  ;;  %v3430_v61 = vor.u32 %v4097_v50, %v3429_v49  ;;  %v3850_v49 = vor.u32 %v4197_v39, %v3847_v42  ;;  %v4042_v39 = vld [vmem:[#allocation5 + $0x2b4] sm:$0xf0] }
 0x11e   :  { %2332 = vmatmul.bf16.vlgmr.msrb.gmra.mxu3 %v4363_v51  ;;  %v3210_v1 = vor.u32 %v4037_v55, %v3207_v58  ;;  %v4117_v50 = vld [vmem:[#allocation5 + $0x514] sm:$0xf] }
 0x11f   :  { %2376 = vmatpush.bf16.msra.mxu3 %v3878_v62  ;;  %2358 = vmatmul.bf16.vlgmr.msra.gmra.mxu1 %v4352_v35  ;;  %v3117_v62 = vld [vmem:[#allocation5 + $0x1d8] sm:$0xf]  ;;  %v4189_v58 = vld [vmem:[#allocation5 + $0x754] sm:$0xf] }
 0x120   :  { %2402 = vmatpush.bf16.msrb.mxu1 %v3370_v63  ;;  %2391 = vmatpush.bf16.msrb.mxu0 %v3050_v3  ;;  %v4018_v63 = vld [vmem:[#allocation5 + $0x1f4] sm:$0xf0]  ;;  %v4089_v3 = vld [vmem:[#allocation5 + $0x42c] sm:$0xf0]  ;;  %v3815_v59 = vld [vmem:[#allocation5 + $0x770] sm:$0xf0] }
 0x121   :  { %2365 = vmatpush.bf16.msra.mxu2 %v3558_v9  ;;  %v3118_v9 = vor.u32 %v4018_v63, %v3117_v62  ;;  %v3398_v12 = vor.u32 %v4089_v3, %v3397_v2  ;;  %v2989_v62 = vld [vmem:[#allocation5 + $0xd8] sm:$0xf]  ;;  %v4109_v2 = vld [vmem:[#allocation5 + $0x4d4] sm:$0xf] }
 0x122   :  { %v3986_v63 = vld [vmem:[#allocation5 + $0xf4] sm:$0xf0]  ;;  %v3495_v3 = vld [vmem:[#allocation5 + $0x4f0] sm:$0xf0] }
 0x123   :  { %2377 = vmatpush.bf16.msra.mxu3 %v3846_v10  ;;  %v4029_v10 = vld [vmem:[#allocation5 + $0x254] sm:$0xf]  ;;  %v3498_v13 = vor.u32 %v4109_v2, %v3495_v3 }
 0x124   :  { %2403 = vmatpush.bf16.msrb.mxu1 %v3338_v11  ;;  %2392 = vmatpush.bf16.msrb.mxu0 %v3018_v16  ;;  %v3175_v11 = vld [vmem:[#allocation5 + $0x270] sm:$0xf0]  ;;  %v3626_v16 = vor.u32 %v4141_v4, %v3623_v6  ;;  %v2990_v6 = vor.u32 %v3986_v63, %v2989_v62  ;;  %v834_v62 = vperm.slane %v4382_v41, 1 }
 0x125   :  { %2366 = vmatpush.bf16.msra.mxu2 %v3526_v22  ;;  %v3178_v21 = vor.u32 %v4029_v10, %v3175_v11  ;;  %v4153_v22 = vld [vmem:[#allocation5 + $0x62c] sm:$0xf0]  ;;  %v4058_v10 = vld [vmem:[#allocation5 + $0x334] sm:$0xf0]  ;;  %v3463_v18 = vld [vmem:[#allocation5 + $0x4b0] sm:$0xf0] }
 0x126   :  { %v3654_v33 = vor.u32 %v4153_v22, %v3653_v20  ;;  %v2957_v11 = vld [vmem:[#allocation5 + $0x98] sm:$0xf] }
 0x127   :  { %2378 = vmatpush.bf16.msra.mxu3 %v3814_v24  ;;  %v4021_v24 = vld [vmem:[#allocation5 + $0x214] sm:$0xf] }
 0x128   :  { %2404 = vmatpush.bf16.msrb.mxu1 %v3306_v25  ;;  %2393 = vmatpush.bf16.msrb.mxu0 %v2986_v29  ;;  %v3143_v25 = vld [vmem:[#allocation5 + $0x230] sm:$0xf0]  ;;  %v3373_v29 = vld [vmem:[#allocation5 + $0x3d8] sm:$0xf] }
 0x129   :  { %2367 = vmatpush.bf16.msra.mxu2 %v3494_v34  ;;  %v3146_v34 = vor.u32 %v4021_v24, %v3143_v25  ;;  %v3374_v40 = vor.u32 %v4082_v30, %v3373_v29  ;;  %v4173_v24 = vld [vmem:[#allocation5 + $0x6d4] sm:$0xf]  ;;  %v3970_v29 = vld [vmem:[#allocation5 + $0x74] sm:$0xf0] }
 0x12a   :  { %v3751_v25 = vld [vmem:[#allocation5 + $0x6f0] sm:$0xf0] }
 0x12b   :  { %2379 = vmatpush.bf16.msra.mxu3 %v3782_v36  ;;  %v3882_v36 = vor.u32 %v4205_v27, %v3879_v28  ;;  %v4050_v27 = vld [vmem:[#allocation5 + $0x2f4] sm:$0xf0] }
 0x12c   :  { %2405 = vmatpush.bf16.msrb.mxu1 %v3274_v37  ;;  %2394 = vmatpush.bf16.msrb.mxu0 %v2954_v56  ;;  %v4125_v37 = vld [vmem:[#allocation5 + $0x554] sm:$0xf]  ;;  %v3054_v56 = vor.u32 %v4002_v31, %v3053_v46  ;;  %v2925_v28 = vld [vmem:[#allocation5 + $0x58] sm:$0xf]  ;;  %v3754_v46 = vor.u32 %v4173_v24, %v3751_v25 }
 0x12d   :  { %2368 = vmatpush.bf16.msra.mxu2 %v3462_v45  ;;  %v3994_v45 = vld [vmem:[#allocation5 + $0x134] sm:$0xf0]  ;;  %v4093_v31 = vld [vmem:[#allocation5 + $0x454] sm:$0xf] }
 0x12e   :  { %v3022_v55 = vor.u32 %v3994_v45, %v3021_v44 }
 0x12f   :  { %2380 = vmatpush.bf16.msra.mxu3 %v3750_v47  ;;  %v3562_v47 = vor.u32 %v4125_v37, %v3559_v38  ;;  %v3719_v37 = vld [vmem:[#allocation5 + $0x6b0] sm:$0xf0]  ;;  %v3213_v38 = vld [vmem:[#allocation5 + $0x298] sm:$0xf] }
 0x130   :  { %2406 = vmatpush.bf16.msrb.mxu1 %v3242_v48  ;;  %2395 = vmatpush.bf16.msrb.mxu0 %v2922_v53  ;;  %v833_v48 = vperm.slane %v4382_v41, 0 }
 0x131   :  { %2369 = vmatpush.bf16.msra.mxu2 %v3430_v61  ;;  %v4066_v61 = vld [vmem:[#allocation5 + $0x374] sm:$0xf0] }
 0x133   :  { %2381 = vmatpush.bf16.msra.mxu3 %v3718_v0  ;;  %v2138_v53 = vpop.f32.mrf.mxu0  ;;  %v3530_v0 = vor.u32 %v4117_v50, %v3527_v52  ;;  %v3214_v52 = vor.u32 %v4042_v39, %v3213_v38  ;;  %v3023_v38 = vld [vmem:[#allocation5 + $0x138] sm:$0xf0] }
 0x134   :  { %2407 = vmatpush.bf16.msrb.mxu1 %v3210_v1  ;;  %2396 = vmatpush.bf16.msrb.mxu0 %v2890_v5  ;;  %v3818_v1 = vor.u32 %v4189_v58, %v3815_v59  ;;  %v2139_v4 = vadd.f32 %v2138_v53, %v833_v48  ;;  %v3310_v5 = vor.u32 %v4066_v61, %v3309_v60  ;;  %v3399_v48 = vld [vmem:[#allocation5 + $0x430] sm:$0xf0]  ;;  %v3181_v60 = vld [vmem:[#allocation5 + $0x258] sm:$0xf] }
 0x135   :  { %2370 = vmatpush.bf16.msra.mxu2 %v3398_v12  ;;  %v3978_v12 = vld [vmem:[#allocation5 + $0xb4] sm:$0xf0]  ;;  %v3687_v58 = vld [vmem:[#allocation5 + $0x670] sm:$0xf0]  ;;  %v3122_v59 = vor.u32 %v4014_v43, %v3119_v57 }
 0x136   :  { %v2958_v22 = vor.u32 %v3978_v12, %v2957_v11  ;;  %v4034_v61 = vld [vmem:[#allocation5 + $0x274] sm:$0xf0] }
 0x137   :  { %2382 = vmatpush.bf16.msra.mxu3 %v3686_v17  ;;  %2397 = vmatmul.bf16.vlgmr.msrb.gmra.mxu0 %v4349_v14  ;;  %v4101_v17 = vld [vmem:[#allocation5 + $0x494] sm:$0xf]  ;;  %v3885_v12 = vld [vmem:[#allocation5 + $0x7d8] sm:$0xf] }
 0x138   :  { %2441 = vmatpush.bf16.msra.mxu0 %v3118_v9  ;;  %2408 = vmatpush.bf16.msrb.mxu1 %v3178_v21  ;;  %v3277_v9 = vld [vmem:[#allocation5 + $0x318] sm:$0xf]  ;;  %v3466_v30 = vor.u32 %v4101_v17, %v3463_v18  ;;  %v3375_v17 = vld [vmem:[#allocation5 + $0x3f8] sm:$0xf0] }
 0x139   :  { %2415 = vmatpush.bf16.msrb.mxu2 %v3626_v16  ;;  %v3786_v16 = vor.u32 %v4181_v7, %v3783_v8  ;;  %v3278_v21 = vor.u32 %v4058_v10, %v3277_v9  ;;  %v3182_v7 = vor.u32 %v4034_v61, %v3181_v60  ;;  %v3655_v8 = vld [vmem:[#allocation5 + $0x630] sm:$0xf0]  ;;  %v3149_v9 = vld [vmem:[#allocation5 + $0x218] sm:$0xf]  ;;  %v3998_v18 = vld [vmem:[#allocation5 + $0x15c] sm:$0xf] }
 0x13a   :  { %2371 = vmatmul.bf16.vlgmr.msra.gmra.mxu2 %v4359_v23  ;;  %v4026_v10 = vld [vmem:[#allocation5 + $0x234] sm:$0xf0] }
 0x13b   :  { %2383 = vmatpush.bf16.msra.mxu3 %v3654_v33  ;;  %v2151_v15 = vpop.f32.mrf.mxu1  ;;  %v2140_v20 = vpop.f32.mrf.mxu0  ;;  %v4114_v60 = vld [vmem:[#allocation5 + $0x4f4] sm:$0xf0] }
 0x13c   :  { %2442 = vmatpush.bf16.msra.mxu0 %v3086_v26  ;;  %2409 = vmatpush.bf16.msrb.mxu1 %v3146_v34  ;;  %v4387_v19 = vadd.f32 %v2151_v15, %v2139_v4  ;;  %v3245_v26 = vld [vmem:[#allocation5 + $0x2d8] sm:$0xf]  ;;  %v2926_v34 = vor.u32 %v3970_v29, %v2925_v28  ;;  %v4078_v15 = vld [vmem:[#allocation5 + $0x3dc] sm:$0xf] }
 0x13d   :  { %2416 = vmatpush.bf16.msrb.mxu2 %v3594_v32  ;;  %v3431_v32 = vld [vmem:[#allocation5 + $0x470] sm:$0xf0]  ;;  %v3246_v33 = vor.u32 %v4050_v27, %v3245_v26  ;;  %v3597_v4 = vld [vmem:[#allocation5 + $0x598] sm:$0xf]  ;;  %v3055_v20 = vld [vmem:[#allocation5 + $0x178] sm:$0xf0]  ;;  %v3150_v27 = vor.u32 %v4026_v10, %v3149_v9 }
 0x13e   :  { %2384 = vmatmul.bf16.vlgmr.msra.gmra.mxu3 %v4363_v51  ;;  %v3434_v42 = vor.u32 %v4093_v31, %v3431_v32  ;;  %v3565_v29 = vld [vmem:[#allocation5 + $0x558] sm:$0xf]  ;;  %v3058_v31 = vor.u32 %v3998_v18, %v3055_v20  ;;  %v3247_v18 = vld [vmem:[#allocation5 + $0x2f8] sm:$0xf0] }
 0x13f   :  { %2428 = vmatpush.bf16.msrb.mxu3 %v3882_v36  ;;  %2410 = vmatmul.bf16.vlgmr.msrb.gmra.mxu1 %v4352_v35  ;;  %v4165_v36 = vld [vmem:[#allocation5 + $0x694] sm:$0xf]  ;;  %v3853_v32 = vld [vmem:[#allocation5 + $0x798] sm:$0xf]  ;;  %v3966_v20 = vld [vmem:[#allocation5 + $0x5c] sm:$0xf] }
 0x140   :  { %2454 = vmatpush.bf16.msra.mxu1 %v3374_v40  ;;  %2443 = vmatpush.bf16.msra.mxu0 %v3054_v56  ;;  %v2893_v40 = vld [vmem:[#allocation5 + $0x18] sm:$0xf]  ;;  %v3722_v45 = vor.u32 %v4165_v36, %v3719_v37  ;;  %v3343_v36 = vld [vmem:[#allocation5 + $0x3b8] sm:$0xf0] }
 0x141   :  { %2417 = vmatpush.bf16.msrb.mxu2 %v3562_v47  ;;  %v3962_v56 = vld [vmem:[#allocation5 + $0x34] sm:$0xf0]  ;;  %v4085_v47 = vld [vmem:[#allocation5 + $0x414] sm:$0xf]  ;;  %v3990_v37 = vld [vmem:[#allocation5 + $0x11c] sm:$0xf] }
 0x142   :  { %v2894_v53 = vor.u32 %v3962_v56, %v2893_v40  ;;  %v3402_v63 = vor.u32 %v4085_v47, %v3399_v48  ;;  %v3533_v56 = vld [vmem:[#allocation5 + $0x518] sm:$0xf]  ;;  %v3026_v57 = vor.u32 %v3990_v37, %v3023_v38  ;;  %v4062_v47 = vld [vmem:[#allocation5 + $0x35c] sm:$0xf] }
 0x143   :  { %2429 = vmatpush.bf16.msrb.mxu3 %v3850_v49  ;;  %v2153_v44 = vpop.f32.mrf.mxu1  ;;  %v3629_v49 = vld [vmem:[#allocation5 + $0x5d8] sm:$0xf]  ;;  %v2190_v50 = vpop.f32.mrf.mxu0  ;;  %v3311_v48 = vld [vmem:[#allocation5 + $0x378] sm:$0xf0] }
 0x144   :  { %2455 = vmatpush.bf16.msra.mxu1 %v3342_v54  ;;  %2444 = vmatpush.bf16.msra.mxu0 %v3022_v55  ;;  %v4146_v54 = vld [vmem:[#allocation5 + $0x5f4] sm:$0xf0]  ;;  %v4157_v55 = vld [vmem:[#allocation5 + $0x654] sm:$0xf]  ;;  %v3314_v61 = vor.u32 %v4062_v47, %v3311_v48  ;;  %v3958_v37 = vld [vmem:[#allocation5 + $0x1c] sm:$0xf] }
 0x145   :  { %2418 = vmatpush.bf16.msrb.mxu2 %v3530_v0  ;;  %v4006_v0 = vld [vmem:[#allocation5 + $0x19c] sm:$0xf]  ;;  %v3630_v2 = vor.u32 %v4146_v54, %v3629_v49  ;;  %v3690_v3 = vor.u32 %v4157_v55, %v3687_v58  ;;  %v3821_v44 = vld [vmem:[#allocation5 + $0x758] sm:$0xf]  ;;  %v835_v54 = vperm.slane %v4382_v41, 2 }
 0x146   :  { %v3982_v49 = vld [vmem:[#allocation5 + $0xdc] sm:$0xf]  ;;  %v3469_v9 = vld [vmem:[#allocation5 + $0x498] sm:$0xf] }
 0x147   :  { %2430 = vmatpush.bf16.msrb.mxu3 %v3818_v1  ;;  %v3087_v1 = vld [vmem:[#allocation5 + $0x1b8] sm:$0xf0]  ;;  %v4106_v10 = vld [vmem:[#allocation5 + $0x4b4] sm:$0xf0] }
 0x148   :  { %2456 = vmatpush.bf16.msra.mxu1 %v3310_v5  ;;  %2445 = vmatpush.bf16.msra.mxu0 %v2990_v6  ;;  %v4138_v5 = vld [vmem:[#allocation5 + $0x5b4] sm:$0xf0]  ;;  %v4149_v6 = vld [vmem:[#allocation5 + $0x614] sm:$0xf]  ;;  %v3090_v11 = vor.u32 %v4006_v0, %v3087_v1  ;;  %v4054_v1 = vld [vmem:[#allocation5 + $0x31c] sm:$0xf] }
 0x149   :  { %2419 = vmatpush.bf16.msrb.mxu2 %v3498_v13  ;;  %v4210_v13 = vld [vmem:[#allocation5 + $0x7f4] sm:$0xf0]  ;;  %v3658_v24 = vor.u32 %v4149_v6, %v3655_v8  ;;  %v2895_v38 = vld [vmem:[#allocation5 + $0x38] sm:$0xf0] }
 0x14a   :  { %v3886_v28 = vor.u32 %v4210_v13, %v3885_v12  ;;  %v4186_v0 = vld [vmem:[#allocation5 + $0x734] sm:$0xf0]  ;;  %v2898_v47 = vor.u32 %v3958_v37, %v2895_v38  ;;  %v3631_v48 = vld [vmem:[#allocation5 + $0x5f8] sm:$0xf0] }
 0x14b   :  { %2431 = vmatpush.bf16.msrb.mxu3 %v3786_v16  ;;  %v2191_v16 = vadd.f32 %v2190_v50, %v834_v62  ;;  %v2192_v26 = vpop.f32.mrf.mxu0  ;;  %v2991_v50 = vld [vmem:[#allocation5 + $0xf8] sm:$0xf0]  ;;  %v3757_v13 = vld [vmem:[#allocation5 + $0x6d8] sm:$0xf] }
 0x14c   :  { %2457 = vmatpush.bf16.msra.mxu1 %v3278_v21  ;;  %2446 = vmatpush.bf16.msra.mxu0 %v2958_v22  ;;  %v2203_v21 = vpop.f32.mrf.mxu1  ;;  %v3598_v22 = vor.u32 %v4138_v5, %v3597_v4  ;;  %v2994_v62 = vor.u32 %v3982_v49, %v2991_v50  ;;  %v2959_v4 = vld [vmem:[#allocation5 + $0xb8] sm:$0xf0]  ;;  %v3693_v49 = vld [vmem:[#allocation5 + $0x658] sm:$0xf] }
 0x14d   :  { %2420 = vmatpush.bf16.msrb.mxu2 %v3466_v30  ;;  %v4390_v25 = vadd.f32 %v2203_v21, %v2191_v16  ;;  %v4130_v30 = vld [vmem:[#allocation5 + $0x574] sm:$0xf0]  ;;  %v4046_v16 = vld [vmem:[#allocation5 + $0x2dc] sm:$0xf] }
 0x14e   :  { %v3566_v39 = vor.u32 %v4130_v30, %v3565_v29  ;;  %v2927_v21 = vld [vmem:[#allocation5 + $0x78] sm:$0xf0]  ;;  %v4098_v29 = vld [vmem:[#allocation5 + $0x474] sm:$0xf0]  ;;  %v3250_v30 = vor.u32 %v4046_v16, %v3247_v18 }
 0x14f   :  { %2432 = vmatpush.bf16.msrb.mxu3 %v3754_v46  ;;  %v3378_v46 = vor.u32 %v4078_v15, %v3375_v17  ;;  %v4178_v15 = vld [vmem:[#allocation5 + $0x6f4] sm:$0xf0]  ;;  %v4198_v16 = vld [vmem:[#allocation5 + $0x79c] sm:$0xf] }
 0x150   :  { %2458 = vmatpush.bf16.msra.mxu1 %v3246_v33  ;;  %2447 = vmatpush.bf16.msra.mxu0 %v2926_v34  ;;  %v4202_v33 = vld [vmem:[#allocation5 + $0x7b4] sm:$0xf0]  ;;  %v4070_v34 = vld [vmem:[#allocation5 + $0x39c] sm:$0xf] }
 0x151   :  { %2421 = vmatpush.bf16.msrb.mxu2 %v3434_v42  ;;  %v3854_v40 = vor.u32 %v4202_v33, %v3853_v32  ;;  %v4122_v42 = vld [vmem:[#allocation5 + $0x534] sm:$0xf0]  ;;  %v3346_v43 = vor.u32 %v4070_v34, %v3343_v36  ;;  %v4038_v33 = vld [vmem:[#allocation5 + $0x29c] sm:$0xf] }
 0x152   :  { %v4170_v32 = vld [vmem:[#allocation5 + $0x6b4] sm:$0xf0]  ;;  %v3215_v36 = vld [vmem:[#allocation5 + $0x2b8] sm:$0xf0] }
 0x153   :  { %2433 = vmatpush.bf16.msrb.mxu3 %v3722_v45  ;;  %v4194_v45 = vld [vmem:[#allocation5 + $0x774] sm:$0xf0]  ;;  %v2242_v55 = vpop.f32.mrf.mxu0  ;;  %v4182_v38 = vld [vmem:[#allocation5 + $0x71c] sm:$0xf] }
 0x154   :  { %2459 = vmatpush.bf16.msra.mxu1 %v3214_v52  ;;  %2448 = vmatpush.bf16.msra.mxu0 %v2894_v53  ;;  %v2205_v52 = vpop.f32.mrf.mxu1  ;;  %v3534_v53 = vor.u32 %v4122_v42, %v3533_v56  ;;  %v3822_v58 = vor.u32 %v4194_v45, %v3821_v44  ;;  %v2243_v17 = vadd.f32 %v2242_v55, %v835_v54  ;;  %v4142_v44 = vld [vmem:[#allocation5 + $0x5dc] sm:$0xf]  ;;  %v4162_v50 = vld [vmem:[#allocation5 + $0x674] sm:$0xf0] }
 0x155   :  { %2422 = vmatpush.bf16.msrb.mxu2 %v3402_v63  ;;  %v3789_v63 = vld [vmem:[#allocation5 + $0x718] sm:$0xf]  ;;  %v3218_v45 = vor.u32 %v4038_v33, %v3215_v36  ;;  %v4030_v52 = vld [vmem:[#allocation5 + $0x25c] sm:$0xf] }
 0x156   :  { %v3790_v8 = vor.u32 %v4186_v0, %v3789_v63  ;;  %v3661_v63 = vld [vmem:[#allocation5 + $0x618] sm:$0xf]  ;;  %v3503_v36 = vld [vmem:[#allocation5 + $0x4f8] sm:$0xf0] }
 0x157   :  { %2434 = vmatpush.bf16.msrb.mxu3 %v3690_v3  ;;  %2449 = vmatmul.bf16.vlgmr.msra.gmra.mxu0 %v4349_v14  ;;  %v3974_v3 = vld [vmem:[#allocation5 + $0x9c] sm:$0xf]  ;;  %v4154_v0 = vld [vmem:[#allocation5 + $0x634] sm:$0xf0] }
 0x158   :  { %2493 = vmatpush.bf16.msrb.mxu0 %v3122_v59  ;;  %2460 = vmatpush.bf16.msra.mxu1 %v3182_v7  ;;  %v3501_v59 = vld [vmem:[#allocation5 + $0x4d8] sm:$0xf]  ;;  %v2962_v12 = vor.u32 %v3974_v3, %v2959_v4  ;;  %v3151_v3 = vld [vmem:[#allocation5 + $0x238] sm:$0xf0] }
 0x159   :  { %2467 = vmatpush.bf16.msra.mxu2 %v3630_v2  ;;  %v3279_v2 = vld [vmem:[#allocation5 + $0x338] sm:$0xf0]  ;;  %v2164_v5 = vpop.f32.mrf.mxu2  ;;  %v3502_v6 = vor.u32 %v4114_v60, %v3501_v59  ;;  %v3694_v59 = vor.u32 %v4162_v50, %v3693_v49 }
 0x15a   :  { %2423 = vmatmul.bf16.vlgmr.msrb.gmra.mxu2 %v4359_v23  ;;  %v2165_v7 = vadd.f32 %v2164_v5, %v4387_v19  ;;  %v4134_v60 = vld [vmem:[#allocation5 + $0x59c] sm:$0xf] }
 0x15b   :  { %2435 = vmatpush.bf16.msrb.mxu3 %v3658_v24  ;;  %v3470_v24 = vor.u32 %v4106_v10, %v3469_v9  ;;  %v2244_v19 = vpop.f32.mrf.mxu0  ;;  %v4206_v4 = vld [vmem:[#allocation5 + $0x7dc] sm:$0xf] }
 0x15c   :  { %2494 = vmatpush.bf16.msrb.mxu0 %v3090_v11  ;;  %2461 = vmatpush.bf16.msra.mxu1 %v3150_v27  ;;  %v3282_v11 = vor.u32 %v4054_v1, %v3279_v2  ;;  %v3758_v27 = vor.u32 %v4178_v15, %v3757_v13  ;;  %v4022_v1 = vld [vmem:[#allocation5 + $0x21c] sm:$0xf] }
 0x15d   :  { %2468 = vmatpush.bf16.msra.mxu2 %v3598_v22  ;;  %v3887_v5 = vld [vmem:[#allocation5 + $0x7f8] sm:$0xf0]  ;;  %v3154_v10 = vor.u32 %v4022_v1, %v3151_v3 }
 0x15e   :  { %2436 = vmatmul.bf16.vlgmr.msrb.gmra.mxu3 %v4363_v51  ;;  %v2255_v22 = vpop.f32.mrf.mxu1  ;;  %v3567_v13 = vld [vmem:[#allocation5 + $0x578] sm:$0xf0] }
 0x15f   :  { %2480 = vmatpush.bf16.msra.mxu3 %v3886_v28  ;;  %2462 = vmatmul.bf16.vlgmr.msra.gmra.mxu1 %v4352_v35  ;;  %v4398_v26 = vadd.f32 %v2255_v22, %v2243_v17  ;;  %v3437_v28 = vld [vmem:[#allocation5 + $0x458] sm:$0xf]  ;;  %v3855_v17 = vld [vmem:[#allocation5 + $0x7b8] sm:$0xf0] }
 0x160   :  { %2506 = vmatpush.bf16.msrb.mxu1 %v3378_v46  ;;  %2495 = vmatpush.bf16.msrb.mxu0 %v3058_v31  ;;  %v2930_v46 = vor.u32 %v3966_v20, %v2927_v21  ;;  %v3725_v31 = vld [vmem:[#allocation5 + $0x698] sm:$0xf]  ;;  %v3438_v56 = vor.u32 %v4098_v29, %v3437_v28  ;;  %v3858_v20 = vor.u32 %v4198_v16, %v3855_v17  ;;  %v4118_v21 = vld [vmem:[#allocation5 + $0x51c] sm:$0xf] }
 0x161   :  { %2469 = vmatpush.bf16.msra.mxu2 %v3566_v39  ;;  %v2177_v34 = vpop.f32.mrf.mxu3  ;;  %v3726_v42 = vor.u32 %v4170_v32, %v3725_v31  ;;  %v4407_v15 = vld [vmem:[%s4445_s5] sm:$0xff] }
 0x162   :  { %v4400_v39 = vadd.f32 %v2177_v34, %v2165_v7  ;;  %v3535_v22 = vld [vmem:[#allocation5 + $0x538] sm:$0xf0]  ;;  %v2556_v29 = vperm.slane %v4407_v15, 1 }
 0x163   :  { %2481 = vmatpush.bf16.msra.mxu3 %v3854_v40  ;;  %v2166_v40 = vpop.f32.mrf.mxu2  ;;  %v4190_v19 = vld [vmem:[#allocation5 + $0x75c] sm:$0xf] }
 0x164   :  { %2507 = vmatpush.bf16.msrb.mxu1 %v3346_v43  ;;  %2496 = vmatpush.bf16.msrb.mxu0 %v3026_v57  ;;  %v3405_v43 = vld [vmem:[#allocation5 + $0x418] sm:$0xf]  ;;  %v4110_v34 = vld [vmem:[#allocation5 + $0x4dc] sm:$0xf] }
 0x165   :  { %2470 = vmatpush.bf16.msra.mxu2 %v3534_v53  ;;  %v4090_v57 = vld [vmem:[#allocation5 + $0x434] sm:$0xf0]  ;;  %v3183_v53 = vld [vmem:[#allocation5 + $0x278] sm:$0xf0] }
 0x166   :  { %v2257_v54 = vpop.f32.mrf.mxu1  ;;  %v3406_v55 = vor.u32 %v4090_v57, %v3405_v43  ;;  %v4174_v49 = vld [vmem:[#allocation5 + $0x6dc] sm:$0xf] }
 0x167   :  { %2482 = vmatpush.bf16.msra.mxu3 %v3822_v58  ;;  %v3634_v58 = vor.u32 %v4142_v44, %v3631_v48  ;;  %v4102_v44 = vld [vmem:[#allocation5 + $0x49c] sm:$0xf] }
 0x168   :  { %2508 = vmatpush.bf16.msrb.mxu1 %v3314_v61  ;;  %2497 = vmatpush.bf16.msrb.mxu0 %v2994_v62  ;;  %v3599_v61 = vld [vmem:[#allocation5 + $0x5b8] sm:$0xf0]  ;;  %v3186_v62 = vor.u32 %v4030_v52, %v3183_v53 }
 0x169   :  { %2471 = vmatpush.bf16.msra.mxu2 %v3502_v6  ;;  %v2179_v2 = vpop.f32.mrf.mxu3  ;;  %v3602_v7 = vor.u32 %v4134_v60, %v3599_v61  ;;  %v3759_v50 = vld [vmem:[#allocation5 + $0x6f8] sm:$0xf0] }
 0x16a   :  { %v3762_v60 = vor.u32 %v4174_v49, %v3759_v50  ;;  %v4094_v61 = vld [vmem:[#allocation5 + $0x45c] sm:$0xf]  ;;  %v2559_v50 = vperm.slane %v4407_v15, 4 }
 0x16b   :  { %2483 = vmatpush.bf16.msra.mxu3 %v3790_v8  ;;  %v2216_v6 = vpop.f32.mrf.mxu2  ;;  %v3662_v8 = vor.u32 %v4154_v0, %v3661_v63  ;;  %v4166_v0 = vld [vmem:[#allocation5 + $0x69c] sm:$0xf] }
 0x16c   :  { %2509 = vmatpush.bf16.msrb.mxu1 %v3282_v11  ;;  %2498 = vmatpush.bf16.msrb.mxu0 %v2962_v12  ;;  %v2217_v9 = vadd.f32 %v2216_v6, %v4390_v25  ;;  %v3890_v11 = vor.u32 %v4206_v4, %v3887_v5  ;;  %v4126_v12 = vld [vmem:[#allocation5 + $0x55c] sm:$0xf]  ;;  %v2545_v25 = vmax.f32 %v4400_v39, 0.0 }
 0x16d   :  { %2472 = vmatpush.bf16.msra.mxu2 %v3470_v24  ;;  %v3570_v18 = vor.u32 %v4126_v12, %v3567_v13  ;;  %v3791_v39 = vld [vmem:[#allocation5 + $0x738] sm:$0xf0] }
 0x16e   :  { %v3794_v57 = vor.u32 %v4182_v38, %v3791_v39  ;;  %v3727_v1 = vld [vmem:[#allocation5 + $0x6b8] sm:$0xf0] }
 0x16f   :  { %2484 = vmatpush.bf16.msra.mxu3 %v3758_v27  ;;  %v3823_v27 = vld [vmem:[#allocation5 + $0x778] sm:$0xf0]  ;;  %v3730_v3 = vor.u32 %v4166_v0, %v3727_v1 }
 0x170   :  { %2510 = vmatpush.bf16.msrb.mxu1 %v3250_v30  ;;  %2499 = vmatpush.bf16.msrb.mxu0 %v2930_v46  ;;  %v3538_v46 = vor.u32 %v4118_v21, %v3535_v22  ;;  %v3826_v33 = vor.u32 %v4190_v19, %v3823_v27  ;;  %v4086_v4 = vld [vmem:[#allocation5 + $0x41c] sm:$0xf]  ;;  %v837_v19 = vperm.slane %v4382_v41, 4 }
 0x171   :  { %2473 = vmatpush.bf16.msra.mxu2 %v3438_v56  ;;  %v2229_v24 = vpop.f32.mrf.mxu3  ;;  %v836_v56 = vperm.slane %v4382_v41, 3  ;;  %v3407_v5 = vld [vmem:[#allocation5 + $0x438] sm:$0xf0] }
 0x172   :  { %v2230_v28 = vadd.f32 %v2229_v24, %v2217_v9  ;;  %v4158_v6 = vld [vmem:[#allocation5 + $0x65c] sm:$0xf]  ;;  %v3410_v12 = vor.u32 %v4086_v4, %v3407_v5  ;;  %v2560_v4 = vperm.slane %v4407_v15, 5 }
 0x173   :  { %2485 = vmatpush.bf16.msra.mxu3 %v3726_v42  ;;  %v2218_v30 = vpop.f32.mrf.mxu2  ;;  %v3506_v42 = vor.u32 %v4110_v34, %v3503_v36  ;;  %v4150_v17 = vld [vmem:[#allocation5 + $0x61c] sm:$0xf]  ;;  %v2558_v34 = vperm.slane %v4407_v15, 3 }
 0x174   :  { %2511 = vmatpush.bf16.msrb.mxu1 %v3218_v45  ;;  %2500 = vmatpush.bf16.msrb.mxu0 %v2898_v47  ;;  %v2546_v32 = vmax.f32 %v2230_v28, 0.0  ;;  %v3471_v45 = vld [vmem:[#allocation5 + $0x4b8] sm:$0xf0] }
 0x175   :  { %2474 = vmatpush.bf16.msra.mxu2 %v3406_v55  ;;  %v3474_v55 = vor.u32 %v4102_v44, %v3471_v45 }
 0x176   :  { %v2294_v37 = vpop.f32.mrf.mxu0  ;;  %v2572_v40 = vmul.f32 %v2556_v29, %v2546_v32 }
 0x177   :  { %2486 = vmatpush.bf16.msra.mxu3 %v3694_v59  ;;  %2501 = vmatmul.bf16.vlgmr.msrb.gmra.mxu0 %v4349_v14  ;;  %v2555_v14 = vperm.slane %v4407_v15, 0  ;;  %v2295_v52 = vadd.f32 %v2294_v37, %v836_v56 }
 0x178   :  { %2512 = vmatpush.bf16.msrb.mxu1 %v3186_v62  ;;  %2475 = vmatmul.bf16.vlgmr.msra.gmra.mxu2 %v4359_v23  ;;  %v2581_v43 = vsel %vm2579_vm0, %v2572_v40, 0.0  ;;  %v3439_v62 = vld [vmem:[#allocation5 + $0x478] sm:$0xf0] }
 0x179   :  { %2519 = vmatpush.bf16.msrb.mxu2 %v3634_v58  ;;  %v2571_v31 = vmul.f32 %v2555_v14, %v2545_v25  ;;  %v2231_v48 = vpop.f32.mrf.mxu3  ;;  %v3442_v2 = vor.u32 %v4094_v61, %v3439_v62 }
 0x17b   :  { %2487 = vmatpush.bf16.msra.mxu3 %v3662_v8  ;;  %v2268_v54 = vpop.f32.mrf.mxu2 }
 0x17c   :  { %2513 = vmatpush.bf16.msrb.mxu1 %v3154_v10  ;;  %v2307_v53 = vpop.f32.mrf.mxu1  ;;  %v2269_v59 = vadd.f32 %v2268_v54, %v4398_v26  ;;  %v2557_v10 = vperm.slane %v4407_v15, 2 }
 0x17d   :  { %2520 = vmatpush.bf16.msrb.mxu2 %v3602_v7  ;;  %v2308_v58 = vadd.f32 %v2307_v53, %v2295_v52  ;;  %v3695_v7 = vld [vmem:[#allocation5 + $0x678] sm:$0xf0] }
 0x17e   :  { %2488 = vmatmul.bf16.vlgmr.msra.gmra.mxu3 %v4363_v51  ;;  %v2296_v63 = vpop.f32.mrf.mxu0  ;;  %v3698_v13 = vor.u32 %v4158_v6, %v3695_v7 }
 0x17f   :  { %2532 = vmatpush.bf16.msrb.mxu3 %v3890_v11  ;;  %2514 = vmatmul.bf16.vlgmr.msrb.gmra.mxu1 %v4352_v35  ;;  %v2580_v35 = vsel %vm2579_vm0, %v2571_v31, 0.0 }
 0x180   :  { %v2582_v47 = vadd.f32 %v2581_v43, %v2580_v35 }
 0x181   :  { %2521 = vmatpush.bf16.msrb.mxu2 %v3570_v18  ;;  %v2281_v8 = vpop.f32.mrf.mxu3  ;;  %v3663_v18 = vld [vmem:[#allocation5 + $0x638] sm:$0xf0] }
 0x182   :  { %v2282_v9 = vadd.f32 %v2281_v8, %v2269_v59  ;;  %v3666_v14 = vor.u32 %v4150_v17, %v3663_v18 }
 0x183   :  { %2533 = vmatpush.bf16.msrb.mxu3 %v3858_v20  ;;  %v2270_v11 = vpop.f32.mrf.mxu2 }
 0x184   :  { %v2309_v26 = vpop.f32.mrf.mxu1  ;;  %v2547_v16 = vmax.f32 %v2282_v9, 0.0 }
 0x185   :  { %2522 = vmatpush.bf16.msrb.mxu2 %v3538_v46 }
 0x186   :  { %v2573_v25 = vmul.f32 %v2557_v10, %v2547_v16 }
 0x187   :  { %2534 = vmatpush.bf16.msrb.mxu3 %v3826_v33 }
 0x188   :  { %v2583_v20 = vsel %vm2579_vm0, %v2573_v25, 0.0 }
 0x189   :  { %2523 = vmatpush.bf16.msrb.mxu2 %v3506_v42  ;;  %v2584_v21 = vadd.f32 %v2583_v20, %v2582_v47  ;;  %v2283_v22 = vpop.f32.mrf.mxu3  ;;  %v838_v42 = vperm.slane %v4382_v41, 5  ;;  %v839_v20 = vperm.slane %v4382_v41, 6 }
 0x18b   :  { %2535 = vmatpush.bf16.msrb.mxu3 %v3794_v57 }
 0x18d   :  { %2524 = vmatpush.bf16.msrb.mxu2 %v3474_v55 }
 0x18f   :  { %2536 = vmatpush.bf16.msrb.mxu3 %v3762_v60 }
 0x191   :  { %2525 = vmatpush.bf16.msrb.mxu2 %v3442_v2 }
 0x193   :  { %2537 = vmatpush.bf16.msrb.mxu3 %v3730_v3 }
 0x194   :  { %v2346_v24 = vpop.f32.mrf.mxu0 }
 0x195   :  { %2526 = vmatpush.bf16.msrb.mxu2 %v3410_v12  ;;  %v2347_v27 = vadd.f32 %v2346_v24, %v837_v19  ;;  %v840_v19 = vperm.slane %v4382_v41, 7 }
 0x197   :  { %2538 = vmatpush.bf16.msrb.mxu3 %v3698_v13 }
 0x198   :  { %2527 = vmatmul.bf16.vlgmr.msrb.gmra.mxu2 %v4359_v23 }
 0x19b   :  { %2539 = vmatpush.bf16.msrb.mxu3 %v3666_v14 }
 0x19c   :  { %v2359_v29 = vpop.f32.mrf.mxu1  ;;  %v2348_v31 = vpop.f32.mrf.mxu0 }
 0x19d   :  { %v2320_v28 = vpop.f32.mrf.mxu2  ;;  %v2360_v46 = vadd.f32 %v2359_v29, %v2347_v27 }
 0x19e   :  { %2540 = vmatmul.bf16.vlgmr.msrb.gmra.mxu3 %v4363_v51  ;;  %v2321_v30 = vadd.f32 %v2320_v28, %v2308_v58 }
 0x1a1   :  { %v2333_v32 = vpop.f32.mrf.mxu3 }
 0x1a2   :  { %v2334_v33 = vadd.f32 %v2333_v32, %v2321_v30  ;;  %v2561_v30 = vperm.slane %v4407_v15, 6 }
 0x1a4   :  { %v2361_v37 = vpop.f32.mrf.mxu1  ;;  %v2548_v23 = vmax.f32 %v2334_v33, 0.0 }
 0x1a5   :  { %v2322_v36 = vpop.f32.mrf.mxu2  ;;  %v2562_v37 = vperm.slane %v4407_v15, 7 }
 0x1a6   :  { %v2574_v38 = vmul.f32 %v2558_v34, %v2548_v23 }
 0x1a8   :  { %v2585_v39 = vsel %vm2579_vm0, %v2574_v38, 0.0 }
 0x1a9   :  { %v2586_v51 = vadd.f32 %v2585_v39, %v2584_v21  ;;  %v2335_v40 = vpop.f32.mrf.mxu3 }
 0x1b4   :  { %v2398_v56 = vpop.f32.mrf.mxu0 }
 0x1b5   :  { %v2399_v35 = vadd.f32 %v2398_v56, %v838_v42 }
 0x1bc   :  { %v2411_v57 = vpop.f32.mrf.mxu1  ;;  %v2400_v47 = vpop.f32.mrf.mxu0 }
 0x1bd   :  { %v2372_v43 = vpop.f32.mrf.mxu2  ;;  %v2412_v45 = vadd.f32 %v2411_v57, %v2399_v35  ;;  %v4217_v35 = vld [vmem:[#allocation2] ss:$0 sm:$0xff] }
 0x1be   :  { %v2373_v44 = vadd.f32 %v2372_v43, %v2360_v46 }
 0x1c1   :  { %v2385_v48 = vpop.f32.mrf.mxu3 }
 0x1c2   :  { %v2386_v49 = vadd.f32 %v2385_v48, %v2373_v44 }
 0x1c4   :  { %v2549_v52 = vmax.f32 %v2386_v49, 0.0  ;;  %v2413_v54 = vpop.f32.mrf.mxu1 }
 0x1c5   :  { %v2374_v53 = vpop.f32.mrf.mxu2 }
 0x1c6   :  { %v2575_v55 = vmul.f32 %v2559_v50, %v2549_v52 }
 0x1c8   :  { %v2587_v58 = vsel %vm2579_vm0, %v2575_v55, 0.0 }
 0x1c9   :  { %v2387_v59 = vpop.f32.mrf.mxu3  ;;  %v2588_v60 = vadd.f32 %v2587_v58, %v2586_v51 }
 0x1d4   :  { %v2450_v61 = vpop.f32.mrf.mxu0 }
 0x1d5   :  { %v2451_v21 = vadd.f32 %v2450_v61, %v839_v20 }
 0x1dc   :  { %v2463_v63 = vpop.f32.mrf.mxu1  ;;  %v2452_v0 = vpop.f32.mrf.mxu0 }
 0x1dd   :  { %v2424_v62 = vpop.f32.mrf.mxu2  ;;  %v2464_v22 = vadd.f32 %v2463_v63, %v2451_v21 }
 0x1de   :  { %v2425_v1 = vadd.f32 %v2424_v62, %v2412_v45 }
 0x1e1   :  { %v2437_v2 = vpop.f32.mrf.mxu3 }
 0x1e2   :  { %v2438_v3 = vadd.f32 %v2437_v2, %v2425_v1 }
 0x1e4   :  { %v2550_v5 = vmax.f32 %v2438_v3, 0.0  ;;  %v2465_v7 = vpop.f32.mrf.mxu1 }
 0x1e5   :  { %v2426_v6 = vpop.f32.mrf.mxu2 }
 0x1e6   :  { %v2576_v8 = vmul.f32 %v2560_v4, %v2550_v5 }
 0x1e8   :  { %v2589_v9 = vsel %vm2579_vm0, %v2576_v8, 0.0 }
 0x1e9   :  { %v2439_v10 = vpop.f32.mrf.mxu3  ;;  %v2590_v26 = vadd.f32 %v2589_v9, %v2588_v60 }
 0x1f4   :  { %v2502_v11 = vpop.f32.mrf.mxu0 }
 0x1f5   :  { %v2503_v28 = vadd.f32 %v2502_v11, %v840_v19 }
 0x1fb   :  { %v2476_v12 = vpop.f32.mrf.mxu2 }
 0x1fc   :  { %v2515_v13 = vpop.f32.mrf.mxu1  ;;  %v2504_v16 = vpop.f32.mrf.mxu0  ;;  %v2477_v24 = vadd.f32 %v2476_v12, %v2464_v22 }
 0x1fd   :  { %v2516_v31 = vadd.f32 %v2515_v13, %v2503_v28 }
 0x201   :  { %v2489_v17 = vpop.f32.mrf.mxu3 }
 0x202   :  { %v2490_v27 = vadd.f32 %v2489_v17, %v2477_v24 }
 0x203   :  { %v2478_v18 = vpop.f32.mrf.mxu2 }
 0x204   :  { %v2517_v25 = vpop.f32.mrf.mxu1  ;;  %v2551_v29 = vmax.f32 %v2490_v27, 0.0 }
 0x206   :  { %v2577_v32 = vmul.f32 %v2561_v30, %v2551_v29 }
 0x208   :  { %v2591_v39 = vsel %vm2579_vm0, %v2577_v32, 0.0 }
 0x209   :  { %v2491_v14 = vpop.f32.mrf.mxu3  ;;  %v2592_v40 = vadd.f32 %v2591_v39, %v2590_v26 }
 0x21b   :  { %v2528_v46 = vpop.f32.mrf.mxu2 }
 0x21c   :  { %v2529_v33 = vadd.f32 %v2528_v46, %v2516_v31 }
 0x221   :  { %v2541_v34 = vpop.f32.mrf.mxu3 }
 0x222   :  { %v2542_v36 = vadd.f32 %v2541_v34, %v2529_v33 }
 0x223   :  { %v2530_v38 = vpop.f32.mrf.mxu2 }
 0x224   :  { %v2552_v23 = vmax.f32 %v2542_v36, 0.0 }
 0x226   :  { %v2578_v51 = vmul.f32 %v2562_v37, %v2552_v23 }
 0x228   :  { %v2593_v41 = vsel %vm2579_vm0, %v2578_v51, 0.0 }
 0x229   :  { %v2543_v56 = vpop.f32.mrf.mxu3  ;;  %v2594_v42 = vadd.f32 %v2593_v41, %v2592_v40 }
 0x22b   :  { %2595 = vadd.xlane.f32.xlu0 %v2594_v42 }
 0x29e   :  { %v2596_v43 = vpop.xlane.xlu0 %2595 }
 0x29f   :  { %v2601_v57 = vadd.f32 %v4217_v35, %v2596_v43 }
 0x2a1   :  { %4218 = vtanh.f32 %v2601_v57 }
 0x2a7   :  { %v4219_v44 = vpop.eup %4218 }
 0x2a8   :  { %2604 = vst.msk [vmem:[%s4447_s7] sm:$0x3] %vm2603_vm1, %v4219_v44 }
 0x2a9   :  { %2609 = vsyncpa [#allocation4], 1 }
 0x2aa   :  { %2610 = vsyncpa [#allocation6], 1 }

</bundles_post_ra>
